<compile_context>
chip_gen: v6e
topology: v6e:2x2x1
jax: 0.10.0
libtpu: 0.0.40
codegen_flags: <defaults>
</compile_context>

<pallas_src>
import functools

import jax
import jax.numpy as jnp
from jax.experimental import pallas as pl
from jax.experimental.pallas import tpu as pltpu

LANES = 128  # TPU vreg lane width


def _softplus(x):
    # Matches torch.nn.Softplus(beta=1, threshold=20): linear above threshold.
    return jnp.where(x > 20.0, x, jnp.log1p(jnp.exp(jnp.minimum(x, 20.0))))


def _net2b_kernel(x_ref, w0_ref, b0_ref, wh_ref, bh_ref, w2_ref, b2_ref, o_ref,
                  *, n_layers):
    # layer0: Sin(P*x_dim -> P*h_dim).  x_scale already folded into w0.
    x = x_ref[...]                                              # (T, P*x_dim)
    pre0 = jnp.dot(x, w0_ref[...],
                   preferred_element_type=jnp.float32) + b0_ref[...]
    h = jnp.sin(pre0)                                           # (T, P*h_dim)

    # layer1: n_layers x (Linear + Softplus), statically unrolled.  Packed
    # block-diagonal weights keep all 128 lanes useful for the EUP/VPU work.
    for n in range(n_layers):
        pre = jnp.dot(h, wh_ref[n],
                      preferred_element_type=jnp.float32) + bh_ref[n]
        h = _softplus(pre)

    # layer2: Linear(P*h_dim -> P*y_dim).  Output stays packed (narrow, fully
    # useful lanes) — no 128-lane zero padding, so HBM writeback is minimal.
    y = jnp.dot(h, w2_ref[...],
                preferred_element_type=jnp.float32) + b2_ref[...]
    o_ref[...] = y.astype(o_ref.dtype)


def prepare_kernel_params(params, *, x_scale):
    """One-time static transform of the (PyTorch-equivalent) parameters:
      - cast everything to f32,
      - fold x_scale into w0,
      - build block-diagonal P-replicated weights / P-tiled biases so that
        P = 128 // h_dim batch samples share each vreg row inside the kernel.
    """
    w0 = x_scale * jnp.asarray(params["w0"], jnp.float32)      # (x_dim, h)
    b0 = jnp.asarray(params["b0"], jnp.float32)                # (1, h)
    wh = jnp.asarray(params["wh"], jnp.float32)                # (L, h, h)
    bh = jnp.asarray(params["bh"], jnp.float32)                # (L, 1, h)
    w2 = jnp.asarray(params["w2"], jnp.float32)                # (h, y)
    b2 = jnp.asarray(params["b2"], jnp.float32)                # (1, y)

    x_dim, h_dim = w0.shape
    y_dim = w2.shape[1]
    n_layers = wh.shape[0]

    # Packing factor: how many samples fit side-by-side in the 128 lanes.
    pack = LANES // h_dim if (h_dim < LANES and LANES % h_dim == 0) else 1

    eye = jnp.eye(pack, dtype=jnp.float32)
    w0p = jnp.kron(eye, w0)                                    # (P*x_dim, P*h)
    whp = jnp.stack([jnp.kron(eye, wh[n]) for n in range(n_layers)], axis=0)
    w2p = jnp.kron(eye, w2)                                    # (P*h, P*y)
    b0p = jnp.tile(b0, (1, pack))                              # (1, P*h)
    bhp = jnp.tile(bh, (1, 1, pack))                           # (L, 1, P*h)
    b2p = jnp.tile(b2, (1, pack))                              # (1, P*y)

    return {"w0": w0p, "b0": b0p, "wh": whp, "bh": bhp, "w2": w2p, "b2": b2p,
            "pack": pack, "x_dim": x_dim, "h_dim": h_dim, "y_dim": y_dim}


def _pick_tile(rows, tile_rows):
    """Tile (in packed rows): multiple of 8, aiming for >=4 grid steps so v7x
    gets >=2 pipelined steps per TensorCore; v6e/v5e just get pipelining."""
    if rows <= 8:
        return rows                       # single full-extent tile (legal)
    t = min(tile_rows, max(8, rows // 4))
    return max(8, (t // 8) * 8)


def net2b_forward(x, kparams, *, n_layers, tile_rows=512):
    """x: (B, x_dim) float32. kparams: output of prepare_kernel_params."""
    B, x_dim = x.shape
    pack, y_dim = kparams["pack"], kparams["y_dim"]
    assert x_dim == kparams["x_dim"]

    # Lane-pack the batch: (B, x_dim) -> (B/P, P*x_dim).  Pure contiguous
    # reshape when B % pack == 0 (the default path); pad only as a fallback.
    b_pack = -(-B // pack) * pack
    if b_pack != B:
        x = jnp.pad(x, ((0, b_pack - B), (0, 0)))
    rows = b_pack // pack
    xp = x.reshape(rows, pack * x_dim)

    t = _pick_tile(rows, tile_rows)
    n_tiles = -(-rows // t)
    rows_pad = n_tiles * t
    if rows_pad != rows:
        # Fallback for ragged row counts; demo shapes divide evenly so this
        # path (and its extra XLA pad/slice) is not taken.
        xp = jnp.pad(xp, ((0, rows_pad - rows), (0, 0)))

    w0, b0 = kparams["w0"], kparams["b0"]          # (P*x_dim, P*h), (1, P*h)
    wh, bh = kparams["wh"], kparams["bh"]          # (L, P*h, P*h), (L, 1, P*h)
    w2, b2 = kparams["w2"], kparams["b2"]          # (P*h, P*y), (1, P*y)
    xin = pack * x_dim
    hp = w0.shape[1]
    yp = pack * y_dim

    kernel = functools.partial(_net2b_kernel, n_layers=n_layers)

    out = pl.pallas_call(
        kernel,
        out_shape=jax.ShapeDtypeStruct((rows_pad, yp), jnp.float32),
        grid_spec=pl.GridSpec(
            grid=(n_tiles,),
            in_specs=[
                pl.BlockSpec((t, xin), lambda i: (i, 0)),                  # x
                # Parameters: constant block index -> resident across grid.
                pl.BlockSpec((xin, hp), lambda i: (0, 0)),                 # w0
                pl.BlockSpec((1, hp), lambda i: (0, 0)),                   # b0
                pl.BlockSpec((n_layers, hp, hp), lambda i: (0, 0, 0)),     # wh
                pl.BlockSpec((n_layers, 1, hp), lambda i: (0, 0, 0)),      # bh
                pl.BlockSpec((hp, yp), lambda i: (0, 0)),                  # w2
                pl.BlockSpec((1, yp), lambda i: (0, 0)),                   # b2
            ],
            out_specs=pl.BlockSpec((t, yp), lambda i: (i, 0)),
        ),
        compiler_params=pltpu.CompilerParams(
            dimension_semantics=("parallel",)),
    )(xp, w0, b0, wh, bh, w2, b2)

    y = out
    if rows_pad != rows:
        y = y[:rows]
    y = y.reshape(rows * pack, y_dim)              # unpack: free reshape
    if b_pack != B:
        y = y[:B]
    return y


def init_net2b_params(key, *, x_dim, h_dim, n_layers, y_dim, gamma):
    """Deterministic parameter init mirroring the PyTorch module's __init__.

    layer0 (Sin, is_first=True): weight ~ U(-1/x_dim, 1/x_dim)
    hidden linears / biases:     torch default ~ U(-1/sqrt(fan_in), 1/sqrt(fan_in))
    layer2: default init then weight *= gamma, bias = 0
    All weights are stored pre-transposed as (in_dim, out_dim).
    """
    keys = jax.random.split(key, 4 + 2 * n_layers)

    w0 = jax.random.uniform(keys[0], (x_dim, h_dim), jnp.float32,
                            minval=-1.0 / x_dim, maxval=1.0 / x_dim)
    bnd0 = 1.0 / jnp.sqrt(jnp.float32(x_dim))
    b0 = jax.random.uniform(keys[1], (1, h_dim), jnp.float32,
                            minval=-bnd0, maxval=bnd0)

    bnd_h = 1.0 / jnp.sqrt(jnp.float32(h_dim))
    wh_list, bh_list = [], []
    for n in range(n_layers):
        wh_list.append(jax.random.uniform(keys[2 + 2 * n], (h_dim, h_dim),
                                          jnp.float32, minval=-bnd_h,
                                          maxval=bnd_h))
        bh_list.append(jax.random.uniform(keys[3 + 2 * n], (1, h_dim),
                                          jnp.float32, minval=-bnd_h,
                                          maxval=bnd_h))
    wh = jnp.stack(wh_list, axis=0)                      # (L, h, h)
    bh = jnp.stack(bh_list, axis=0)                      # (L, 1, h)

    w2 = gamma * jax.random.uniform(keys[2 + 2 * n_layers], (h_dim, y_dim),
                                    jnp.float32, minval=-bnd_h, maxval=bnd_h)
    b2 = jnp.zeros((1, y_dim), jnp.float32)

    return {"w0": w0, "b0": b0, "wh": wh, "bh": bh, "w2": w2, "b2": b2}


def net2b_reference(x, params, *, x_scale, n_layers):
    """Pure-JAX reference for correctness checking (uses original params)."""
    h = jnp.sin(jnp.dot(x_scale * x, params["w0"]) + params["b0"])
    for n in range(n_layers):
        h = jax.nn.softplus(jnp.dot(h, params["wh"][n]) + params["bh"][n])
    return jnp.dot(h, params["w2"]) + params["b2"]


if __name__ == "__main__":
    # Net2b(x_dim=4, h_dim=32, n_layers=2, x_scale=3.0, alpha=1.0, gamma=0.1,
    # y_dim=2).  batch=1024 lane-packs 4 samples/row -> 256 packed rows,
    # tile=64 rows -> grid=(4,): >=2 pipelined steps per TensorCore on v7x,
    # and no wrapper pad/slice ops on this path.
    x_dim, h_dim, n_layers, y_dim = 4, 32, 2, 2
    x_scale, gamma = 3.0, 0.1
    batch = 1024

    key = jax.random.PRNGKey(0)
    k_params, k_x = jax.random.split(key)
    params = init_net2b_params(k_params, x_dim=x_dim, h_dim=h_dim,
                               n_layers=n_layers, y_dim=y_dim, gamma=gamma)
    kparams = prepare_kernel_params(params, x_scale=x_scale)
    x = jax.random.normal(k_x, (batch, x_dim), jnp.float32)

    y = net2b_forward(x, kparams, n_layers=n_layers)
    y = jax.block_until_ready(y)

    y_ref = net2b_reference(x, params, x_scale=x_scale, n_layers=n_layers)
    assert y.shape == (batch, y_dim)
    assert jnp.allclose(y, y_ref, atol=1e-5, rtol=1e-5), "mismatch vs reference"

    print("KERNEL_OK")
</pallas_src>

<mosaic_0001>
module attributes {stable_mosaic.version = 11 : i64} {
  func.func @_net2b_kernel(%arg0: i32, %arg1: memref<64x16xf32, #tpu.memory_space<vmem>>, %arg2: memref<16x128xf32, #tpu.memory_space<vmem>>, %arg3: memref<1x128xf32, #tpu.memory_space<vmem>>, %arg4: memref<2x128x128xf32, #tpu.memory_space<vmem>>, %arg5: memref<2x1x128xf32, #tpu.memory_space<vmem>>, %arg6: memref<128x8xf32, #tpu.memory_space<vmem>>, %arg7: memref<1x8xf32, #tpu.memory_space<vmem>>, %arg8: memref<64x8xf32, #tpu.memory_space<vmem>>) attributes {dimension_semantics = [#tpu.dimension_semantics<parallel>], iteration_bounds = array<i64: 4>, scalar_prefetch = 0 : i64, scratch_operands = 0 : i64, tpu.core_type = #tpu.core_type<tc>, window_params = [{transform_indices = @transform_0, window_bounds = array<i64: 64, 16>}, {pipeline_mode = #tpu.pipeline_mode<synchronous>, transform_indices = @transform_1, window_bounds = array<i64: 16, 128>}, {pipeline_mode = #tpu.pipeline_mode<synchronous>, transform_indices = @transform_2, window_bounds = array<i64: 1, 128>}, {pipeline_mode = #tpu.pipeline_mode<synchronous>, transform_indices = @transform_3, window_bounds = array<i64: 2, 128, 128>}, {pipeline_mode = #tpu.pipeline_mode<synchronous>, transform_indices = @transform_4, window_bounds = array<i64: 2, 1, 128>}, {pipeline_mode = #tpu.pipeline_mode<synchronous>, transform_indices = @transform_5, window_bounds = array<i64: 128, 8>}, {pipeline_mode = #tpu.pipeline_mode<synchronous>, transform_indices = @transform_6, window_bounds = array<i64: 1, 8>}, {transform_indices = @transform_7, window_bounds = array<i64: 64, 8>}]} {
    %c0 = arith.constant 0 : index
    %c0_0 = arith.constant 0 : index
    %0 = vector.load %arg1[%c0, %c0_0] : memref<64x16xf32, #tpu.memory_space<vmem>>, vector<64x16xf32>
    %c0_1 = arith.constant 0 : index
    %c0_2 = arith.constant 0 : index
    %1 = vector.load %arg2[%c0_1, %c0_2] : memref<16x128xf32, #tpu.memory_space<vmem>>, vector<16x128xf32>
    %cst = arith.constant dense<0.000000e+00> : vector<64x128xf32>
    %2 = tpu.matmul %0, %1, %cst {dimension_numbers = #tpu.dot_dimension_numbers<[1], [0], [0], [1], [0, 0, 1, 1], [], []>} : vector<64x16xf32>, vector<16x128xf32>, vector<64x128xf32> -> vector<64x128xf32>
    %c0_3 = arith.constant 0 : index
    %c0_4 = arith.constant 0 : index
    %3 = vector.load %arg3[%c0_3, %c0_4] : memref<1x128xf32, #tpu.memory_space<vmem>>, vector<1x128xf32>
    %4 = vector.broadcast %3 : vector<1x128xf32> to vector<64x128xf32>
    %5 = arith.addf %2, %4 : vector<64x128xf32>
    %6 = math.sin %5 : vector<64x128xf32>
    %c0_5 = arith.constant 0 : index
    %c0_6 = arith.constant 0 : index
    %c0_7 = arith.constant 0 : index
    %7 = vector.load %arg4[%c0_5, %c0_6, %c0_7] : memref<2x128x128xf32, #tpu.memory_space<vmem>>, vector<1x128x128xf32>
    %8 = vector.shape_cast %7 : vector<1x128x128xf32> to vector<128x128xf32>
    %cst_8 = arith.constant dense<0.000000e+00> : vector<64x128xf32>
    %9 = tpu.matmul %6, %8, %cst_8 {dimension_numbers = #tpu.dot_dimension_numbers<[1], [0], [0], [1], [0, 0, 1, 1], [], []>} : vector<64x128xf32>, vector<128x128xf32>, vector<64x128xf32> -> vector<64x128xf32>
    %c0_9 = arith.constant 0 : index
    %c0_10 = arith.constant 0 : index
    %c0_11 = arith.constant 0 : index
    %10 = vector.load %arg5[%c0_9, %c0_10, %c0_11] : memref<2x1x128xf32, #tpu.memory_space<vmem>>, vector<1x1x128xf32>
    %11 = vector.shape_cast %10 : vector<1x1x128xf32> to vector<1x128xf32>
    %12 = vector.broadcast %11 : vector<1x128xf32> to vector<64x128xf32>
    %13 = arith.addf %9, %12 : vector<64x128xf32>
    %cst_12 = arith.constant 2.000000e+01 : f32
    %14 = vector.broadcast %cst_12 : f32 to vector<64x128xf32>
    %15 = arith.cmpf ogt, %13, %14 : vector<64x128xf32>
    %cst_13 = arith.constant 2.000000e+01 : f32
    %16 = vector.broadcast %cst_13 : f32 to vector<64x128xf32>
    %17 = arith.minimumf %13, %16 : vector<64x128xf32>
    %18 = math.exp %17 : vector<64x128xf32>
    %19 = math.log1p %18 : vector<64x128xf32>
    %20 = arith.select %15, %13, %19 : vector<64x128xi1>, vector<64x128xf32>
    %c1 = arith.constant 1 : index
    %c0_14 = arith.constant 0 : index
    %c0_15 = arith.constant 0 : index
    %21 = vector.load %arg4[%c1, %c0_14, %c0_15] : memref<2x128x128xf32, #tpu.memory_space<vmem>>, vector<1x128x128xf32>
    %22 = vector.shape_cast %21 : vector<1x128x128xf32> to vector<128x128xf32>
    %cst_16 = arith.constant dense<0.000000e+00> : vector<64x128xf32>
    %23 = tpu.matmul %20, %22, %cst_16 {dimension_numbers = #tpu.dot_dimension_numbers<[1], [0], [0], [1], [0, 0, 1, 1], [], []>} : vector<64x128xf32>, vector<128x128xf32>, vector<64x128xf32> -> vector<64x128xf32>
    %c1_17 = arith.constant 1 : index
    %c0_18 = arith.constant 0 : index
    %c0_19 = arith.constant 0 : index
    %24 = vector.load %arg5[%c1_17, %c0_18, %c0_19] : memref<2x1x128xf32, #tpu.memory_space<vmem>>, vector<1x1x128xf32>
    %25 = vector.shape_cast %24 : vector<1x1x128xf32> to vector<1x128xf32>
    %26 = vector.broadcast %25 : vector<1x128xf32> to vector<64x128xf32>
    %27 = arith.addf %23, %26 : vector<64x128xf32>
    %cst_20 = arith.constant 2.000000e+01 : f32
    %28 = vector.broadcast %cst_20 : f32 to vector<64x128xf32>
    %29 = arith.cmpf ogt, %27, %28 : vector<64x128xf32>
    %cst_21 = arith.constant 2.000000e+01 : f32
    %30 = vector.broadcast %cst_21 : f32 to vector<64x128xf32>
    %31 = arith.minimumf %27, %30 : vector<64x128xf32>
    %32 = math.exp %31 : vector<64x128xf32>
    %33 = math.log1p %32 : vector<64x128xf32>
    %34 = arith.select %29, %27, %33 : vector<64x128xi1>, vector<64x128xf32>
    %c0_22 = arith.constant 0 : index
    %c0_23 = arith.constant 0 : index
    %35 = vector.load %arg6[%c0_22, %c0_23] : memref<128x8xf32, #tpu.memory_space<vmem>>, vector<128x8xf32>
    %cst_24 = arith.constant dense<0.000000e+00> : vector<64x8xf32>
    %36 = tpu.matmul %34, %35, %cst_24 {dimension_numbers = #tpu.dot_dimension_numbers<[1], [0], [0], [1], [0, 0, 1, 1], [], []>} : vector<64x128xf32>, vector<128x8xf32>, vector<64x8xf32> -> vector<64x8xf32>
    %c0_25 = arith.constant 0 : index
    %c0_26 = arith.constant 0 : index
    %37 = vector.load %arg7[%c0_25, %c0_26] : memref<1x8xf32, #tpu.memory_space<vmem>>, vector<1x8xf32>
    %38 = vector.broadcast %37 : vector<1x8xf32> to vector<64x8xf32>
    %39 = arith.addf %36, %38 : vector<64x8xf32>
    %c0_27 = arith.constant 0 : index
    %c0_28 = arith.constant 0 : index
    %40 = vector.load %arg8[%c0_27, %c0_28] : memref<64x8xf32, #tpu.memory_space<vmem>>, vector<64x8xf32>
    tpu.vector_store %arg8[%c0_27, %c0_28], %39 {strides = array<i32>} : memref<64x8xf32, #tpu.memory_space<vmem>>, vector<64x8xf32>,
    return
  }
  func.func @transform_0(%arg0: i32) -> (i32, i32) {
    %c0_i32 = arith.constant 0 : i32
    %c0_i32_0 = arith.constant 0 : i32
    return %arg0, %c0_i32 : i32, i32
  }
  func.func @transform_1(%arg0: i32) -> (i32, i32) {
    %c0_i32 = arith.constant 0 : i32
    %c0_i32_0 = arith.constant 0 : i32
    %c0_i32_1 = arith.constant 0 : i32
    return %c0_i32, %c0_i32_0 : i32, i32
  }
  func.func @transform_2(%arg0: i32) -> (i32, i32) {
    %c0_i32 = arith.constant 0 : i32
    %c0_i32_0 = arith.constant 0 : i32
    %c0_i32_1 = arith.constant 0 : i32
    return %c0_i32, %c0_i32_0 : i32, i32
  }
  func.func @transform_3(%arg0: i32) -> (i32, i32, i32) {
    %c0_i32 = arith.constant 0 : i32
    %c0_i32_0 = arith.constant 0 : i32
    %c0_i32_1 = arith.constant 0 : i32
    %c0_i32_2 = arith.constant 0 : i32
    return %c0_i32, %c0_i32_0, %c0_i32_1 : i32, i32, i32
  }
  func.func @transform_4(%arg0: i32) -> (i32, i32, i32) {
    %c0_i32 = arith.constant 0 : i32
    %c0_i32_0 = arith.constant 0 : i32
    %c0_i32_1 = arith.constant 0 : i32
    %c0_i32_2 = arith.constant 0 : i32
    return %c0_i32, %c0_i32_0, %c0_i32_1 : i32, i32, i32
  }
  func.func @transform_5(%arg0: i32) -> (i32, i32) {
    %c0_i32 = arith.constant 0 : i32
    %c0_i32_0 = arith.constant 0 : i32
    %c0_i32_1 = arith.constant 0 : i32
    return %c0_i32, %c0_i32_0 : i32, i32
  }
  func.func @transform_6(%arg0: i32) -> (i32, i32) {
    %c0_i32 = arith.constant 0 : i32
    %c0_i32_0 = arith.constant 0 : i32
    %c0_i32_1 = arith.constant 0 : i32
    return %c0_i32, %c0_i32_0 : i32, i32
  }
  func.func @transform_7(%arg0: i32) -> (i32, i32) {
    %c0_i32 = arith.constant 0 : i32
    %c0_i32_0 = arith.constant 0 : i32
    return %arg0, %c0_i32 : i32, i32
  }
}

</mosaic_0001>

<bundles_post_ra>
// kernel: tpu_custom_call.1
= control target key start
LH: loop header
LB: loop body
LE: loop exit
PB: predicated region body
PF: predicated region fallthrough
CT: control target
= control target key end

     0   :  { %s2466_s24 = smov 0   ;;  %s3621_s0 = inlined_call_operand.vmem [shape: f32[256,16], index: 0, kind: input, shape index: {}]   ;;  %s3622_s1 = inlined_call_operand.vmem [shape: f32[16,128], index: 1, kind: input, shape index: {}]   ;;  %s3623_s2 = inlined_call_operand.vmem [shape: f32[1,128], index: 2, kind: input, shape index: {}]   ;;  %s3624_s3 = inlined_call_operand.vmem [shape: f32[2,128,128], index: 3, kind: input, shape index: {}]   ;;  %s3625_s4 = inlined_call_operand.vmem [shape: f32[2,1,128], index: 4, kind: input, shape index: {}]   ;;  %s3626_s5 = inlined_call_operand.vmem [shape: f32[128,8], index: 5, kind: input, shape index: {}]   ;;  %s3627_s6 = inlined_call_operand.vmem [shape: f32[1,8], index: 6, kind: input, shape index: {}]   ;;  %s3628_s7 = inlined_call_operand.vmem [shape: f32[256,8], index: 7, kind: output, shape index: {}]  }
   0x1 LB: > { %s1936_s25 = sadd.s32 4294967295, %s2418_s24   ;;  %p1940_p0 = scmp.ge.s32.totalorder %s2418_s24, 1  ;;  %s2418_s24 = sphi %s2466_s24, %s17_s24  }
   0x2   : > { %p238_p1 = scmp.lt.s32.totalorder %s2418_s24, 5 }
   0x4   : > { %p239_p2 = pnand %p1940_p0, %p238_p1 }
   0x6   : > { %242 = sbr.rel (%p239_p2) target bundleno = 1097 (0x449), region = 48 }
   0xb   : > { %v291_v0 = vld [vmem:[%s3622_s1 + $0x8] sm:$0xff]  ;;  %v290_v1 = vld [vmem:[%s3622_s1] sm:$0xff]  ;;  %s1941_s30 = sshll.u32 %s1936_s25, 3  ;;  %vm299_vm0 = vcmask 130048   ;;  %v3643_v32 = vmov 683565275  }
   0xc   : > { %2090 = vmatprep.subr.mxu0 %v291_v0  ;;  %p271_p3 = scmp.lt.s32.totalorder %s1941_s30, 31  ;;  %v2499_v10 = vld [vmem:[%s3623_s2] ss:$0 sm:$0xff]  ;;  %v3639_v34 = vmov 2475754826  }
   0xd   : > { %2091 = vmatpush3.msra.mxu0 %v291_v0  ;;  %v3641_v38 = vmov 2131351028   ;;  %v3634_v41 = vmov 2102212464   ;;  %v3649_v44 = vmov 920167782  }
   0xe   : > { %2092 = vmatprep.subr.mxu0 %v290_v1  ;;  %s3735_s30 = smov (!%p271_p3, %s1941_s30), 31  ;;  %v3636_v47 = vmov 1326507024  }
   0xf   : > { %2093 = vmatpush3.msra.mxu0 %v290_v1  ;;  %s1942_s8 = sshll.u32 %s3735_s30, 3 }
  0x10   : > { %s274_s11 = scalar_lea.vmem %s3621_s0, %s1942_s8  ;;  %s280_s18 = scalar_lea.vmem %s3628_s7, %s1942_s8 }
  0x11   : > { %v282_v2 = vld [vmem:[%s274_s11] sm:$0xff]  ;;  %v283_v3 = vld [vmem:[%s274_s11 + $0x8] sm:$0xff]  ;;  %v284_v4 = vld [vmem:[%s274_s11 + $0x10] sm:$0xff] }
  0x12   : > { %2094 = vmatprep.mubr.msk.f32.mxu0 %vm299_vm0, %v282_v2  ;;  %v285_v5 = vld [vmem:[%s274_s11 + $0x18] sm:$0xff]  ;;  %v286_v6 = vld [vmem:[%s274_s11 + $0x20] sm:$0xff]  ;;  %v287_v7 = vld [vmem:[%s274_s11 + $0x28] sm:$0xff] }
  0x13   : > { %2095 = vmatmul.mubr.msk.f32.vlgmr.msra.gmra.mxu0 %vm299_vm0, %v283_v3  ;;  %v288_v8 = vld [vmem:[%s274_s11 + $0x30] sm:$0xff]  ;;  %v289_v9 = vld [vmem:[%s274_s11 + $0x38] sm:$0xff] }
  0x14   : > { %2097 = vmatprep.mubr.msk.f32.mxu0 %vm299_vm0, %v284_v4 }
  0x17   : > { %2098 = vmatmul.mubr.msk.f32.gmra.mxu0 %vm299_vm0, %v285_v5 }
  0x18   : > { %2100 = vmatprep.mubr.msk.f32.mxu0 %vm299_vm0, %v286_v6 }
  0x1b   : > { %2101 = vmatmul.mubr.msk.f32.gmra.mxu0 %vm299_vm0, %v287_v7 }
  0x1c   : > { %2103 = vmatprep.mubr.msk.f32.mxu0 %vm299_vm0, %v288_v8 }
  0x1f   : > { %2104 = vmatmul.mubr.msk.f32.gmra.mxu0 %vm299_vm0, %v289_v9 }
  0xd3   : > { %v2096_v11 = vpop.f32.mrf.mxu0 }
  0xd4   : > { %v2502_v12 = vadd.f32 %v2096_v11, %v2499_v10 }
  0xd5   : > { %v2504_v13 = vpop.f32.mrf.mxu0 }
  0xd6   : > { %v536_v14 = vand.u32 2139095040, %v2502_v12  ;;  %v3633_v18 = vand.u32 2147483647, %v2502_v12 }
  0xd7   : > { %v2099_v15 = vpop.f32.mrf.mxu0 }
  0xd8   : > { %v537_v16 = vshrl.u32 %v536_v14, 23  ;;  %v2508_v17 = vadd.f32 %v2099_v15, %v2499_v10  ;;  %v540_v23 = vand.u32 8388607, %v3633_v18 }
  0xd9   : > { %v400_v21 = vpop.f32.mrf.mxu0 }
  0xda   : > { %v1958_v19 = vadd.s32 4294967169, %v537_v16  ;;  %v744_v20 = vand.u32 2139095040, %v2508_v17  ;;  %v2515_v24 = vadd.f32 %v2499_v10, %v400_v21  ;;  %v541_v28 = vor.u32 8388608, %v540_v23 }
  0xdb   : > { %v3631_v52 = vand.u32 2147483647, %v2508_v17  ;;  %v2571_v16 = vadd.f32 %v2499_v10, %v2504_v13 }
  0xdc   : > { %v543_v22 = vadd.s32 1, %v1958_v19  ;;  %v745_v26 = vshrl.u32 %v744_v20, 23  ;;  %v640_v30 = vand.u32 2139095040, %v2515_v24  ;;  %v2547_v63 = vshll.u32 %v541_v28, 8 }
  0xdd   : > { %v748_v2 = vand.u32 8388607, %v3631_v52  ;;  %3666 = vst [vmem:[#allocation2_spill] sm:$0xff] %v2571_v16 }
  0xde   : > { %vm544_vm1 = vcmp.gt.s32.totalorder %v543_v22, 0  ;;  %v1966_v36 = vadd.s32 4294967169, %v745_v26  ;;  %v641_v60 = vshrl.u32 %v640_v30, 23 }
  0xdf   : > { %v545_v25 = vsel %vm544_vm1, %v543_v22, 0  ;;  %v749_v19 = vor.u32 8388608, %v748_v2 }
  0xe0   : > { %v547_v27 = vand.u32 31, %v545_v25  ;;  %v2518_v31 = vshrl.u32 %v545_v25, 5  ;;  %v751_v55 = vadd.s32 1, %v1966_v36  ;;  %v1962_v7 = vadd.s32 4294967169, %v641_v60 }
  0xe1   : > { %v432_v60 = vand.u32 2139095040, %v2571_v16 }
  0xe2   : > { %v548_v29 = vsub.s32 32, %v547_v27  ;;  %v550_v33 = vshll.u32 %v3643_v32, %v547_v27  ;;  %v553_v35 = vshll.u32 %v3639_v34, %v547_v27  ;;  %v556_v40 = vshll.u32 %v3641_v38, %v547_v27 }
  0xe3   : > { %v559_v43 = vshll.u32 %v3634_v41, %v547_v27  ;;  %v562_v46 = vshll.u32 %v3649_v44, %v547_v27  ;;  %vm565_vm2 = vcmp.lt.s32.totalorder %v2518_v31, 1  ;;  %vm568_vm3 = vcmp.lt.s32.totalorder %v2518_v31, 4 }
  0xe4   : > { %v551_v37 = vshrl.u32 %v3639_v34, %v548_v29  ;;  %v554_v39 = vshrl.u32 %v3641_v38, %v548_v29  ;;  %v557_v42 = vshrl.u32 %v3634_v41, %v548_v29  ;;  %v560_v45 = vshrl.u32 %v3649_v44, %v548_v29 }
  0xe5   : > { %v563_v48 = vshrl.u32 %v3636_v47, %v548_v29  ;;  %vm567_vm4 = vcmp.lt.s32.totalorder %v2518_v31, 3  ;;  %vm566_vm5 = vcmp.lt.s32.totalorder %v2518_v31, 2  ;;  %vm752_vm6 = vcmp.gt.s32.totalorder %v751_v55, 0 }
  0xe6   : > { %v552_v49 = vor.u32 %v551_v37, %v550_v33  ;;  %v555_v50 = vor.u32 %v554_v39, %v553_v35  ;;  %v558_v51 = vor.u32 %v557_v42, %v556_v40  ;;  %v561_v53 = vor.u32 %v560_v45, %v559_v43  ;;  %v1276_v39 = vld [vmem:[%s3624_s3 + $0x78] sm:$0xff] }
  0xe7   : > { %v564_v54 = vor.u32 %v563_v48, %v562_v46  ;;  %v549_v8 = vshrl.u32 %v3643_v32, %v548_v29  ;;  %v753_v11 = vsel %vm752_vm6, %v751_v55, 0  ;;  %v647_v23 = vadd.s32 1, %v1962_v7  ;;  %2106 = vmatprep.subr.mxu1 %v1276_v39  ;;  %v2102_v7 = vpop.f32.mrf.mxu0 }
  0xe8   : > { %v573_v56 = vsel %vm565_vm2, %v552_v49, %v555_v50  ;;  %v577_v57 = vsel %vm565_vm2, %v555_v50, %v558_v51  ;;  %v574_v58 = vsel %vm568_vm3, %v561_v53, 920167782  ;;  %v570_v9 = vsel %vm568_vm3, %v558_v51, 2102212464  ;;  %2107 = vmatpush3.msra.mxu1 %v1276_v39 }
  0xe9   : > { %v578_v59 = vsel %vm568_vm3, %v564_v54, 1326507024  ;;  %v575_v61 = vsel %vm567_vm4, %v558_v51, %v574_v58  ;;  %v755_v14 = vand.u32 31, %v753_v11  ;;  %v569_v15 = vsel %vm565_vm2, %v549_v8, %v552_v49 }
  0xea   : > { %v579_v62 = vsel %vm567_vm4, %v561_v53, %v578_v59  ;;  %v576_v0 = vsel %vm566_vm5, %v573_v56, %v575_v61  ;;  %v571_v20 = vsel %vm567_vm4, %v555_v50, %v570_v9  ;;  %v2575_v21 = vshrl.u32 %v753_v11, 5  ;;  %v1275_v50 = vld [vmem:[%s3624_s3 + $0x70] sm:$0xff]  ;;  %v1274_v59 = vld [vmem:[%s3624_s3 + $0x68] sm:$0xff] }
  0xeb   : > { %v580_v1 = vsel %vm566_vm5, %v577_v57, %v579_v62  ;;  %v2560_v5 = vmul.u32.u64.low %v2547_v63, %v576_v0  ;;  %v2561_v6 = vmul.u32.u64.high %v2547_v63, %v576_v0, %v2560_v5  ;;  %v756_v22 = vsub.s32 32, %v755_v14  ;;  %2108 = vmatprep.subr.mxu1 %v1275_v50  ;;  %v1273_v0 = vld [vmem:[%s3624_s3 + $0x60] sm:$0xff] }
  0xec   : > { %v2556_v3 = vmul.u32.u64.low %v2547_v63, %v580_v1  ;;  %v2557_v4 = vmul.u32.u64.high %v2547_v63, %v580_v1, %v2556_v3  ;;  %v758_v26 = vshll.u32 %v3643_v32, %v755_v14  ;;  %v761_v27 = vshll.u32 %v3639_v34, %v755_v14  ;;  %2109 = vmatpush3.msra.mxu1 %v1275_v50  ;;  %v1269_v50 = vld [vmem:[%s3624_s3 + $0x40] sm:$0xff] }
  0xed   : > { %v591_v25 = vadd.s32 1, %v2561_v6  ;;  %v759_v13 = vshrl.u32 %v3639_v34, %v756_v22  ;;  %v762_v28 = vshrl.u32 %v3641_v38, %v756_v22  ;;  %v764_v29 = vshll.u32 %v3641_v38, %v755_v14  ;;  %2110 = vmatprep.subr.mxu1 %v1274_v59 }
  0xee   : > { %vm590_vm7 = vc.u32 %v2557_v4, %v2560_v5  ;;  %v767_v30 = vshll.u32 %v3634_v41, %v755_v14  ;;  %v765_v33 = vshrl.u32 %v3634_v41, %v756_v22  ;;  %v768_v35 = vshrl.u32 %v3649_v44, %v756_v22  ;;  %2111 = vmatpush3.msra.mxu1 %v1274_v59 }
  0xef   : > { %v770_v36 = vshll.u32 %v3649_v44, %v755_v14  ;;  %v771_v37 = vshrl.u32 %v3636_v47, %v756_v22  ;;  %v572_v40 = vsel %vm566_vm5, %v569_v15, %v571_v20  ;;  %v760_v42 = vor.u32 %v759_v13, %v758_v26  ;;  %2112 = vmatprep.subr.mxu1 %v1273_v0  ;;  %v1272_v14 = vld [vmem:[%s3624_s3 + $0x58] sm:$0xff] }
  0xf0   : > { %v2595_v43 = vor.u32 %v762_v28, %v761_v27  ;;  %v2597_v45 = vshll.u32 %v749_v19, 8  ;;  %v766_v46 = vor.u32 %v765_v33, %v764_v29  ;;  %v769_v48 = vor.u32 %v768_v35, %v767_v30  ;;  %2113 = vmatpush3.msra.mxu1 %v1273_v0  ;;  %v1270_v35 = vld [vmem:[%s3624_s3 + $0x48] sm:$0xff] }
  0xf1   : > { %v772_v49 = vor.u32 %v771_v37, %v770_v36  ;;  %vm773_vm8 = vcmp.lt.s32.totalorder %v2575_v21, 1  ;;  %v592_v31 = vsel %vm590_vm7, %v591_v25, %v2561_v6  ;;  %vm776_vm9 = vcmp.lt.s32.totalorder %v2575_v21, 4  ;;  %2114 = vmatprep.subr.mxu1 %v1272_v14  ;;  %v1271_v25 = vld [vmem:[%s3624_s3 + $0x50] sm:$0xff] }
  0xf2   : > { %v781_v51 = vsel %vm773_vm8, %v760_v42, %v2595_v43  ;;  %vm648_vm10 = vcmp.gt.s32.totalorder %v647_v23, 0  ;;  %vm775_vm11 = vcmp.lt.s32.totalorder %v2575_v21, 3  ;;  %v782_v53 = vsel %vm776_vm9, %v769_v48, 920167782  ;;  %2115 = vmatpush3.msra.mxu1 %v1272_v14 }
  0xf3   : > { %v785_v54 = vsel %vm773_vm8, %v2595_v43, %v766_v46  ;;  %v786_v55 = vsel %vm776_vm9, %v772_v49, 1326507024  ;;  %v588_v56 = vmul.u32 %v2547_v63, %v572_v40  ;;  %vm774_vm12 = vcmp.lt.s32.totalorder %v2575_v21, 2  ;;  %2116 = vmatprep.subr.mxu1 %v1271_v25 }
  0xf4   : > { %v783_v57 = vsel %vm775_vm11, %v766_v46, %v782_v53  ;;  %v787_v58 = vsel %vm775_vm11, %v769_v48, %v786_v55  ;;  %v649_v63 = vsel %vm648_vm10, %v647_v23, 0  ;;  %v3632_v6 = vand.u32 2147483647, %v2515_v24  ;;  %2117 = vmatpush3.msra.mxu1 %v1271_v25 }
  0xf5   : > { %v784_v61 = vsel %vm774_vm12, %v781_v51, %v783_v57  ;;  %v788_v62 = vsel %vm774_vm12, %v785_v54, %v787_v58  ;;  %v2636_v1 = vadd.s32 %v592_v31, %v588_v56  ;;  %v651_v11 = vand.u32 31, %v649_v63  ;;  %2118 = vmatprep.subr.mxu1 %v1270_v35  ;;  %v1268_v56 = vld [vmem:[%s3624_s3 + $0x38] sm:$0xff] }
  0xf6   : > { %v2639_v2 = vmul.u32.u64.low %v2597_v45, %v788_v62  ;;  %v2640_v3 = vmul.u32.u64.high %v2597_v45, %v788_v62, %v2639_v2  ;;  %v2644_v8 = vmul.u32.u64.low %v2597_v45, %v784_v61  ;;  %v2645_v9 = vmul.u32.u64.high %v2597_v45, %v784_v61, %v2644_v8  ;;  %2119 = vmatpush3.msra.mxu1 %v1270_v35  ;;  %v1267_v62 = vld [vmem:[%s3624_s3 + $0x30] sm:$0xff]  ;;  %v1264_v35 = vld [vmem:[%s3624_s3 + $0x18] sm:$0xff] }
  0xf7   : > { %v757_v15 = vshrl.u32 %v3643_v32, %v756_v22  ;;  %v433_v19 = vshrl.u32 %v432_v60, 23  ;;  %v652_v20 = vsub.s32 32, %v651_v11  ;;  %v2653_v23 = vadd.f32 %v2102_v7, %v2499_v10  ;;  %2120 = vmatprep.subr.mxu1 %v1269_v50 }
  0xf8   : > { %v594_v26 = vadd.s32 536870912, %v2636_v1  ;;  %v778_v13 = vsel %vm776_vm9, %v766_v46, 2102212464  ;;  %v644_v22 = vand.u32 8388607, %v3632_v6  ;;  %v2665_v28 = vshrl.u32 %v649_v63, 5  ;;  %2121 = vmatpush3.msra.mxu1 %v1269_v50 }
  0xf9   : > { %v777_v27 = vsel %vm773_vm8, %v757_v15, %v760_v42  ;;  %v654_v29 = vshll.u32 %v3643_v32, %v651_v11  ;;  %v655_v30 = vshrl.u32 %v3639_v34, %v652_v20  ;;  %v658_v33 = vshrl.u32 %v3641_v38, %v652_v20  ;;  %2122 = vmatprep.subr.mxu1 %v1268_v56 }
  0xfa   : > { %v657_v36 = vshll.u32 %v3639_v34, %v651_v11  ;;  %v661_v37 = vshrl.u32 %v3634_v41, %v652_v20  ;;  %v663_v39 = vshll.u32 %v3634_v41, %v651_v11  ;;  %v664_v40 = vshrl.u32 %v3649_v44, %v652_v20  ;;  %2123 = vmatpush3.msra.mxu1 %v1268_v56 }
  0xfb   : > { %v779_v42 = vsel %vm775_vm11, %v2595_v43, %v778_v13  ;;  %v660_v46 = vshll.u32 %v3641_v38, %v651_v11  ;;  %v666_v48 = vshll.u32 %v3649_v44, %v651_v11  ;;  %v667_v49 = vshrl.u32 %v3636_v47, %v652_v20  ;;  %2124 = vmatprep.subr.mxu1 %v1267_v62 }
  0xfc   : > { %v799_v31 = vadd.s32 1, %v2645_v9  ;;  %v656_v51 = vor.u32 %v655_v30, %v654_v29  ;;  %v659_v53 = vor.u32 %v658_v33, %v657_v36  ;;  %v665_v54 = vor.u32 %v664_v40, %v663_v39  ;;  %2125 = vmatpush3.msra.mxu1 %v1267_v62 }
  0xfd   : > { %vm798_vm13 = vc.u32 %v2640_v3, %v2644_v8  ;;  %v662_v43 = vor.u32 %v661_v37, %v660_v46  ;;  %v668_v55 = vor.u32 %v667_v49, %v666_v48  ;;  %v2692_v57 = vshrl.u32 %v594_v26, 30  ;;  %v1265_v26 = vld [vmem:[%s3624_s3 + $0x20] sm:$0xff]  ;;  %v1263_v46 = vld [vmem:[%s3624_s3 + $0x10] sm:$0xff] }
  0xfe   : > { %v645_v58 = vor.u32 8388608, %v644_v22  ;;  %vm672_vm14 = vcmp.lt.s32.totalorder %v2665_v28, 4  ;;  %v780_v59 = vsel %vm774_vm12, %v777_v27, %v779_v42  ;;  %vm669_vm15 = vcmp.lt.s32.totalorder %v2665_v28, 1 }
  0xff   : > { %3667 = vst [vmem:[#allocation3_spill] sm:$0xff] %v2692_v57  ;;  %v678_v60 = vsel %vm672_vm14, %v665_v54, 920167782  ;;  %v952_v61 = vand.u32 2139095040, %v2653_v23  ;;  %v1954_v63 = vadd.s32 4294967169, %v433_v19  ;;  %v800_v0 = vsel %vm798_vm13, %v799_v31, %v2645_v9  ;;  %v1266_v9 = vld [vmem:[%s3624_s3 + $0x28] sm:$0xff] }
 0x100   : > { %vm671_vm0 = vcmp.lt.s32.totalorder %v2665_v28, 3  ;;  %v677_v21 = vsel %vm669_vm15, %v656_v51, %v659_v53  ;;  %v674_v2 = vsel %vm672_vm14, %v662_v43, 2102212464  ;;  %v681_v11 = vsel %vm669_vm15, %v659_v53, %v662_v43  ;;  %2126 = vmatprep.subr.mxu1 %v1266_v9 }
 0x101   : > { %v679_v7 = vsel %vm671_vm0, %v662_v43, %v678_v60  ;;  %v682_v14 = vsel %vm672_vm14, %v668_v55, 1326507024  ;;  %v796_v15 = vmul.u32 %v2597_v45, %v780_v59  ;;  %v653_v19 = vshrl.u32 %v3643_v32, %v652_v20  ;;  %2127 = vmatpush3.msra.mxu1 %v1266_v9 }
 0x102   : > { %vm670_vm1 = vcmp.lt.s32.totalorder %v2665_v28, 2  ;;  %v685_v25 = vshll.u32 %v645_v58, 8  ;;  %v596_v27 = vshll.u32 %v2692_v57, 30  ;;  %v683_v22 = vsel %vm671_vm0, %v665_v54, %v682_v14  ;;  %2128 = vmatprep.subr.mxu1 %v1265_v26  ;;  %v1262_v54 = vld [vmem:[%s3624_s3 + $0x8] sm:$0xff]  ;;  %v410_v58 = vpop.f32.mrf.mxu0 }
 0x103   : > { %v680_v13 = vsel %vm670_vm1, %v677_v21, %v679_v7  ;;  %v953_v29 = vshrl.u32 %v952_v61, 23  ;;  %v2733_v45 = vadd.s32 %v800_v0, %v796_v15  ;;  %v673_v20 = vsel %vm669_vm15, %v653_v19, %v656_v51  ;;  %2129 = vmatpush3.msra.mxu1 %v1265_v26 }
 0x104   : > { %v675_v30 = vsel %vm671_vm0, %v659_v53, %v674_v2  ;;  %v684_v33 = vsel %vm670_vm1, %v681_v11, %v683_v22  ;;  %v2747_v39 = vmul.u32.u64.low %v685_v25, %v680_v13  ;;  %v2748_v40 = vmul.u32.u64.high %v685_v25, %v680_v13, %v2747_v39  ;;  %2130 = vmatprep.subr.mxu1 %v1264_v35 }
 0x105   : > { %v2744_v36 = vmul.u32.u64.low %v685_v25, %v684_v33  ;;  %v2745_v37 = vmul.u32.u64.high %v685_v25, %v684_v33, %v2744_v36  ;;  %v1974_v42 = vadd.s32 4294967169, %v953_v29  ;;  %v439_v48 = vadd.s32 1, %v1954_v63  ;;  %2131 = vmatpush3.msra.mxu1 %v1264_v35 }
 0x106   : > { %v676_v49 = vsel %vm670_vm1, %v673_v20, %v675_v30  ;;  %v2757_v50 = vsub.s32 %v2636_v1, %v596_v27  ;;  %v802_v31 = vadd.s32 536870912, %v2733_v45  ;;  %v3629_v51 = vand.u32 2147483647, %v2653_v23  ;;  %2132 = vmatprep.subr.mxu1 %v1263_v46  ;;  %v1261_v1 = vld [vmem:[%s3624_s3] sm:$0xff] }
 0x107   : > { %v959_v53 = vadd.s32 1, %v1974_v42  ;;  %vm694_vm2 = vc.u32 %v2745_v37, %v2747_v39  ;;  %v695_v28 = vadd.s32 1, %v2748_v40  ;;  %v692_v43 = vmul.u32 %v685_v25, %v676_v49  ;;  %2133 = vmatpush3.msra.mxu1 %v1263_v46 }
 0x108   : > { %vm440_vm4 = vcmp.gt.s32.totalorder %v439_v48, 0  ;;  %2134 = vmatprep.subr.mxu1 %v1262_v54  ;;  %v599_v59 = vsub.s32 0, %v2757_v50  ;;  %v2772_v60 = vshrl.u32 %v802_v31, 30  ;;  %v956_v62 = vand.u32 8388607, %v3629_v51 }
 0x109   : > { %vm960_vm3 = vcmp.gt.s32.totalorder %v959_v53, 0  ;;  %v696_v55 = vsel %vm694_vm2, %v695_v28, %v2748_v40  ;;  %2135 = vmatpush3.msra.mxu1 %v1262_v54  ;;  %v2777_v0 = vadd.f32 %v2499_v10, %v410_v58  ;;  %v2779_v21 = vsel %vm440_vm4, %v439_v48, 0 }
 0x10a   : > { %v961_v56 = vsel %vm960_vm3, %v959_v53, 0  ;;  %3668 = vst [vmem:[#allocation4_spill] sm:$0xff] %v2772_v60  ;;  %v697_v61 = vadd.s32 %v696_v55, %v692_v43  ;;  %2136 = vmatprep.subr.mxu1 %v1261_v1  ;;  %v1959_v7 = vmin.u32 %v599_v59, %v2757_v50  ;;  %v804_v11 = vshll.u32 %v2772_v60, 30 }
 0x10b   : > { %v963_v63 = vand.u32 31, %v961_v56  ;;  %2137 = vmatpush3.msra.mxu1 %v1261_v1  ;;  %v957_v9 = vor.u32 8388608, %v956_v62  ;;  %v962_v27 = vshrl.u32 %v961_v56, 5  ;;  %v848_v29 = vand.u32 2139095040, %v2777_v0 }
 0x10c   : > { %v698_v14 = vadd.s32 536870912, %v697_v61  ;;  %v2793_v36 = vand.u32 31, %v2779_v21  ;;  %v601_v46 = vclz %v1959_v7  ;;  %v2800_v53 = vsub.s32 %v2733_v45, %v804_v11 }
 0x10d   : > { %v964_v2 = vsub.s32 32, %v963_v63  ;;  %v966_v15 = vshll.u32 %v3643_v32, %v963_v63  ;;  %v969_v25 = vshll.u32 %v3639_v34, %v963_v63  ;;  %v972_v13 = vshll.u32 %v3641_v38, %v963_v63 }
 0x10e   : > { %v975_v33 = vshll.u32 %v3634_v41, %v963_v63  ;;  %v2795_v40 = vshrl.u32 %v698_v14, 30  ;;  %v978_v49 = vshll.u32 %v3649_v44, %v963_v63  ;;  %vm981_vm5 = vcmp.lt.s32.totalorder %v962_v27, 1 }
 0x10f   : > { %v967_v19 = vshrl.u32 %v3639_v34, %v964_v2  ;;  %v970_v26 = vshrl.u32 %v3641_v38, %v964_v2  ;;  %v973_v22 = vshrl.u32 %v3634_v41, %v964_v2  ;;  %v976_v35 = vshrl.u32 %v3649_v44, %v964_v2 }
 0x110   : > { %3669 = vst [vmem:[#allocation5_spill] sm:$0xff] %v2795_v40  ;;  %v979_v31 = vshrl.u32 %v3636_v47, %v964_v2  ;;  %v997_v54 = vshll.u32 %v957_v9, 8  ;;  %v849_v28 = vshrl.u32 %v848_v29, 23  ;;  %v965_v43 = vshrl.u32 %v3643_v32, %v964_v2 }
 0x111   : > { %v968_v20 = vor.u32 %v967_v19, %v966_v15  ;;  %v971_v30 = vor.u32 %v970_v26, %v969_v25  ;;  %v974_v42 = vor.u32 %v973_v22, %v972_v13  ;;  %v977_v48 = vor.u32 %v976_v35, %v975_v33  ;;  %v2105_v25 = vpop.f32.mrf.mxu0 }
 0x112   : > { %v980_v1 = vor.u32 %v979_v31, %v978_v49  ;;  %vm984_vm6 = vcmp.lt.s32.totalorder %v962_v27, 4  ;;  %v700_v56 = vshll.u32 %v2795_v40, 30  ;;  %vm983_vm7 = vcmp.lt.s32.totalorder %v962_v27, 3 }
 0x113   : > { %v989_v55 = vsel %vm981_vm5, %v968_v20, %v971_v30  ;;  %v986_v58 = vsel %vm984_vm6, %v974_v42, 2102212464  ;;  %v990_v59 = vsel %vm984_vm6, %v977_v48, 920167782  ;;  %vm982_vm8 = vcmp.lt.s32.totalorder %v962_v27, 2 }
 0x114   : > { %v991_v62 = vsel %vm983_vm7, %v974_v42, %v990_v59  ;;  %v993_v63 = vsel %vm981_vm5, %v971_v30, %v974_v42  ;;  %v994_v45 = vsel %vm984_vm6, %v980_v1, 1326507024  ;;  %v2807_v7 = vsub.s32 32, %v2793_v36 }
 0x115   : > { %v985_v11 = vsel %vm981_vm5, %v965_v43, %v968_v20  ;;  %v992_v2 = vsel %vm982_vm8, %v989_v55, %v991_v62  ;;  %v987_v14 = vsel %vm983_vm7, %v971_v30, %v986_v58  ;;  %v995_v9 = vsel %vm983_vm7, %v977_v48, %v994_v45 }
 0x116   : > { %v2811_v15 = vmul.u32.u64.low %v997_v54, %v992_v2  ;;  %v2812_v19 = vmul.u32.u64.high %v997_v54, %v992_v2, %v2811_v15  ;;  %v1960_v26 = vadd.s32 4294967294, %v601_v46  ;;  %v807_v13 = vsub.s32 0, %v2800_v53 }
 0x117   : > { %v996_v22 = vsel %vm982_vm8, %v993_v63, %v995_v9  ;;  %v1970_v29 = vadd.s32 4294967169, %v849_v28  ;;  %v2817_v33 = vsub.s32 %v697_v61, %v700_v56  ;;  %v988_v20 = vsel %vm982_vm8, %v985_v11, %v987_v14 }
 0x118   : > { %v2819_v35 = vmul.u32.u64.low %v997_v54, %v996_v22  ;;  %v2820_v42 = vmul.u32.u64.high %v997_v54, %v996_v22, %v2819_v35  ;;  %v3630_v30 = vand.u32 2147483647, %v2777_v0  ;;  %v2825_v49 = vadd.f32 %v2105_v25, %v2499_v10 }
 0x119   : > { %v855_v48 = vadd.s32 1, %v1970_v29  ;;  %v1007_v46 = vadd.s32 1, %v2812_v19  ;;  %vm1961_vm9 = vcmp.lt.s32.totalorder %v1960_v26, 0  ;;  %v456_v31 = vshrl.u32 %v3649_v44, %v2807_v7 }
 0x11a   : > { %3670 = vst [vmem:[#allocation6_spill] sm:$0xff] %v2825_v49  ;;  %v1967_v61 = vmin.u32 %v807_v13, %v2800_v53  ;;  %v703_v28 = vsub.s32 0, %v2817_v33  ;;  %v1004_v43 = vmul.u32 %v997_v54, %v988_v20  ;;  %vm1006_vm11 = vc.u32 %v2820_v42, %v2811_v15 }
 0x11b   : > { %vm856_vm10 = vcmp.gt.s32.totalorder %v855_v48, 0  ;;  %v455_v1 = vshll.u32 %v3634_v41, %v2793_v36  ;;  %v1008_v55 = vsel %vm1006_vm11, %v1007_v46, %v2812_v19  ;;  %v852_v56 = vand.u32 8388607, %v3630_v30 }
 0x11c   : > { %v857_v27 = vsel %vm856_vm10, %v855_v48, 0  ;;  %v1160_v58 = vand.u32 2139095040, %v2825_v49  ;;  %v2841_v59 = vshrl.u32 %v2779_v21, 5  ;;  %v1009_v62 = vadd.s32 %v1008_v55, %v1004_v43 }
 0x11d   : > { %v859_v63 = vand.u32 31, %v857_v27  ;;  %v2845_v45 = vsel %vm1961_vm9, 0, %v1960_v26  ;;  %v2847_v11 = vor.u32 %v456_v31, %v455_v1  ;;  %v2851_v2 = vshll.u32 %v3649_v44, %v2793_v36 }
 0x11e   : > { %v2855_v14 = vshrl.u32 %v3636_v47, %v2807_v7  ;;  %v809_v9 = vclz %v1967_v61  ;;  %v1963_v21 = vmin.u32 %v703_v28, %v2817_v33  ;;  %v1010_v19 = vadd.s32 536870912, %v1009_v62 }
 0x11f   : > { %v860_v25 = vsub.s32 32, %v859_v63  ;;  %v853_v13 = vor.u32 8388608, %v852_v56  ;;  %v858_v22 = vshrl.u32 %v857_v27, 5  ;;  %v862_v26 = vshll.u32 %v3643_v32, %v859_v63 }
 0x120   : > { %v1161_v29 = vshrl.u32 %v1160_v58, 23  ;;  %v865_v20 = vshll.u32 %v3639_v34, %v859_v63  ;;  %v868_v46 = vshll.u32 %v3641_v38, %v859_v63  ;;  %v2863_v31 = vshrl.u32 %v1010_v19, 30 }
 0x121   : > { %v863_v35 = vshrl.u32 %v3639_v34, %v860_v25  ;;  %v866_v48 = vshrl.u32 %v3641_v38, %v860_v25  ;;  %v869_v61 = vshrl.u32 %v3634_v41, %v860_v25  ;;  %v871_v28 = vshll.u32 %v3634_v41, %v859_v63 }
 0x122   : > { %3671 = vst [vmem:[#allocation7_spill] sm:$0xff] %v2863_v31  ;;  %v872_v43 = vshrl.u32 %v3649_v44, %v860_v25  ;;  %vm464_vm12 = vcmp.lt.s32.totalorder %v2841_v59, 4  ;;  %v874_v55 = vshll.u32 %v3649_v44, %v859_v63  ;;  %v875_v56 = vshrl.u32 %v3636_v47, %v860_v25 }
 0x123   : > { %v864_v27 = vor.u32 %v863_v35, %v862_v26  ;;  %v867_v1 = vor.u32 %v866_v48, %v865_v20  ;;  %v870_v58 = vor.u32 %v869_v61, %v868_v46  ;;  %v893_v30 = vshll.u32 %v853_v13, 8 }
 0x124   : > { %v873_v51 = vor.u32 %v872_v43, %v871_v28  ;;  %v1982_v52 = vadd.s32 4294967169, %v1161_v29  ;;  %v861_v19 = vshrl.u32 %v3643_v32, %v860_v25  ;;  %v876_v6 = vor.u32 %v875_v56, %v874_v55 }
 0x125   : > { %vm877_vm13 = vcmp.lt.s32.totalorder %v858_v22, 1  ;;  %vm880_vm14 = vcmp.lt.s32.totalorder %v858_v22, 4  ;;  %vm879_vm15 = vcmp.lt.s32.totalorder %v858_v22, 3  ;;  %v1012_v26 = vshll.u32 %v2863_v31, 30 }
 0x126   : > { %v882_v18 = vsel %vm880_vm14, %v870_v58, 2102212464  ;;  %v885_v54 = vsel %vm877_vm13, %v864_v27, %v867_v1  ;;  %v886_v41 = vsel %vm880_vm14, %v873_v51, 920167782  ;;  %vm878_vm0 = vcmp.lt.s32.totalorder %v858_v22, 2 }
 0x127   : > { %v887_v35 = vsel %vm879_vm15, %v870_v58, %v886_v41  ;;  %v889_v63 = vsel %vm877_vm13, %v867_v1, %v870_v58  ;;  %v609_v20 = vsub.s32 4294967266, %v2845_v45  ;;  %v881_v48 = vsel %vm877_vm13, %v861_v19, %v864_v27 }
 0x128   : > { %v888_v13 = vsel %vm878_vm0, %v885_v54, %v887_v35  ;;  %v890_v29 = vsel %vm880_vm14, %v876_v6, 1326507024  ;;  %v883_v46 = vsel %vm879_vm15, %v867_v1, %v882_v18  ;;  %v1968_v43 = vadd.s32 4294967294, %v809_v9 }
 0x129   : > { %v891_v25 = vsel %vm879_vm15, %v873_v51, %v890_v29  ;;  %v2875_v61 = vmul.u32.u64.low %v893_v30, %v888_v13  ;;  %v2876_v28 = vmul.u32.u64.high %v893_v30, %v888_v13, %v2875_v61  ;;  %v705_v55 = vclz %v1963_v21 }
 0x12a   : > { %v892_v56 = vsel %vm878_vm0, %v889_v63, %v891_v25  ;;  %v1167_v47 = vadd.s32 1, %v1982_v52  ;;  %v460_v41 = vor.u32 %v2855_v14, %v2851_v2  ;;  %v2882_v58 = vsub.s32 %v1009_v62, %v1012_v26  ;;  %v420_v52 = vpop.f32.mrf.mxu0 }
 0x12b   : > { %v2884_v27 = vmul.u32.u64.low %v893_v30, %v892_v56  ;;  %v2885_v19 = vmul.u32.u64.high %v893_v30, %v892_v56, %v2884_v27  ;;  %v589_v18 = vadd.s32 %v2560_v5, %v2557_v4  ;;  %v2892_v6 = vsel %vm464_vm12, %v2847_v11, 920167782 }
 0x12c   : > { %v884_v51 = vsel %vm878_vm0, %v881_v48, %v883_v46  ;;  %vm1168_vm1 = vcmp.gt.s32.totalorder %v1167_v47, 0  ;;  %v605_v54 = vsub.s32 32, %v2845_v45  ;;  %v2896_v2 = vadd.s32 127, %v609_v20 }
 0x12d   : > { %v903_v62 = vadd.s32 1, %v2876_v28  ;;  %v1169_v14 = vsel %vm1168_vm1, %v1167_v47, 0  ;;  %vm1969_vm2 = vcmp.lt.s32.totalorder %v1968_v43, 0  ;;  %v1964_v9 = vadd.s32 4294967294, %v705_v55 }
 0x12e   : > { %v3638_v4 = vand.u32 2147483647, %v2825_v49  ;;  %v1171_v5 = vand.u32 31, %v1169_v14  ;;  %v1015_v21 = vsub.s32 0, %v2882_v58  ;;  %v900_v1 = vmul.u32 %v893_v30, %v884_v51 }
 0x12f   : > { %vm902_vm3 = vc.u32 %v2885_v19, %v2875_v61  ;;  %v2904_v22 = vadd.f32 %v2499_v10, %v420_v52  ;;  %v2910_v47 = vsel %vm464_vm12, %v460_v41, 1326507024  ;;  %v2913_v20 = vshrl.u32 %v589_v18, %v605_v54 }
 0x130   : > { %v904_v35 = vsel %vm902_vm3, %v903_v62, %v2876_v28  ;;  %v1172_v63 = vsub.s32 32, %v1171_v5  ;;  %v2916_v48 = vsel %vm1969_vm2, 0, %v1968_v43  ;;  %vm1965_vm4 = vcmp.lt.s32.totalorder %v1964_v9, 0 }
 0x131   : > { %3672 = vst [vmem:[#allocation8_spill] sm:$0xff] %v2904_v22  ;;  %v905_v13 = vadd.s32 %v904_v35, %v900_v1  ;;  %v1164_v10 = vand.u32 8388607, %v3638_v4  ;;  %v1975_v25 = vmin.u32 %v1015_v21, %v2882_v58  ;;  %v1174_v28 = vshll.u32 %v3643_v32, %v1171_v5 }
 0x132   : > { %v1175_v29 = vshrl.u32 %v3639_v34, %v1172_v63  ;;  %v1178_v46 = vshrl.u32 %v3641_v38, %v1172_v63  ;;  %v1056_v56 = vand.u32 2139095040, %v2904_v22  ;;  %v1170_v41 = vshrl.u32 %v1169_v14, 5 }
 0x133   : > { %v906_v55 = vadd.s32 536870912, %v905_v13  ;;  %v1177_v43 = vshll.u32 %v3639_v34, %v1171_v5  ;;  %v1180_v27 = vshll.u32 %v3641_v38, %v1171_v5  ;;  %v3673_v18 = vmov 2102212464  }
 0x134   : > { %v1181_v51 = vshrl.u32 %v3673_v18, %v1172_v63  ;;  %v1176_v54 = vor.u32 %v1175_v29, %v1174_v28  ;;  %v1183_v62 = vshll.u32 %v3673_v18, %v1171_v5  ;;  %v1184_v1 = vshrl.u32 %v3649_v44, %v1172_v63 }
 0x135   : > { %v2928_v52 = vshrl.u32 %v906_v55, 30  ;;  %v1179_v21 = vor.u32 %v1178_v46, %v1177_v43  ;;  %v1186_v4 = vshll.u32 %v3649_v44, %v1171_v5  ;;  %v3675_v30 = vmov 1326507024  }
 0x136   : > { %v1182_v35 = vor.u32 %v1181_v51, %v1180_v27  ;;  %v1187_v26 = vshrl.u32 %v3675_v30, %v1172_v63  ;;  %v817_v14 = vsub.s32 4294967266, %v2916_v48  ;;  %v2936_v34 = vsel %vm1965_vm4, 0, %v1964_v9 }
 0x137   : > { %3674 = vst [vmem:[#allocation9_spill] sm:$0xff] %v2928_v52  ;;  %v908_v38 = vshll.u32 %v2928_v52, 30  ;;  %v1185_v55 = vor.u32 %v1184_v1, %v1183_v62  ;;  %v1017_v32 = vclz %v1975_v25  ;;  %v1165_v29 = vor.u32 8388608, %v1164_v10 }
 0x138   : > { %v1188_v28 = vor.u32 %v1187_v26, %v1186_v4  ;;  %v1057_v31 = vshrl.u32 %v1056_v56, 23  ;;  %v3676_v46 = vmov 683565275   ;;  %vm1189_vm5 = vcmp.lt.s32.totalorder %v1170_v41, 1 }
 0x139   : > { %v2939_v49 = vsub.s32 %v905_v13, %v908_v38  ;;  %v1173_v43 = vshrl.u32 %v3676_v46, %v1172_v63  ;;  %vm1192_vm6 = vcmp.lt.s32.totalorder %v1170_v41, 4  ;;  %vm1191_vm7 = vcmp.lt.s32.totalorder %v1170_v41, 3 }
 0x13a   : > { %v1194_v5 = vsel %vm1192_vm6, %v1182_v35, 2102212464  ;;  %v1197_v27 = vsel %vm1189_vm5, %v1176_v54, %v1179_v21  ;;  %v1198_v51 = vsel %vm1192_vm6, %v1185_v55, 920167782  ;;  %vm1190_vm8 = vcmp.lt.s32.totalorder %v1170_v41, 2 }
 0x13b   : > { %v911_v9 = vsub.s32 0, %v2939_v49  ;;  %v1199_v44 = vsel %vm1191_vm7, %v1182_v35, %v1198_v51  ;;  %v1201_v52 = vsel %vm1189_vm5, %v1179_v21, %v1182_v35  ;;  %v1202_v10 = vsel %vm1192_vm6, %v1188_v28, 1326507024 }
 0x13c   : > { %v1200_v25 = vsel %vm1190_vm8, %v1197_v27, %v1199_v44  ;;  %v1205_v4 = vshll.u32 %v1165_v29, 8  ;;  %v1978_v26 = vadd.s32 4294967169, %v1057_v31  ;;  %v1193_v38 = vsel %vm1189_vm5, %v1173_v43, %v1176_v54 }
 0x13d   : > { %v1195_v13 = vsel %vm1191_vm7, %v1179_v21, %v1194_v5  ;;  %v1203_v56 = vsel %vm1191_vm7, %v1185_v55, %v1202_v10  ;;  %v3659_v63 = vand.u32 2147483647, %v2904_v22  ;;  %v1976_v57 = vadd.s32 4294967294, %v1017_v32 }
 0x13e   : > { %v1204_v62 = vsel %vm1190_vm8, %v1201_v52, %v1203_v56  ;;  %v2946_v1 = vmul.u32.u64.low %v1205_v4, %v1200_v25  ;;  %v2947_v60 = vmul.u32.u64.high %v1205_v4, %v1200_v25, %v2946_v1  ;;  %v1063_v40 = vadd.s32 1, %v1978_v26 }
 0x13f   : > { %v1971_v35 = vmin.u32 %v911_v9, %v2939_v49  ;;  %v2951_v51 = vmul.u32.u64.low %v1205_v4, %v1204_v62  ;;  %v2952_v44 = vmul.u32.u64.high %v1205_v4, %v1204_v62, %v2951_v51  ;;  %v2956_v31 = vadd.s32 %v2644_v8, %v2640_v3 }
 0x140   : > { %3677 = vst [vmem:[#allocation10_spill] sm:$0xff] %v2946_v1  ;;  %v2958_v54 = vadd.s32 127, %v817_v14  ;;  %v1196_v21 = vsel %vm1190_vm8, %v1193_v38, %v1195_v13  ;;  %vm1064_vm9 = vcmp.gt.s32.totalorder %v1063_v40, 0  ;;  %v3679_v52 = vshll.u32 %v2757_v50, %v2845_v45 }
 0x141   : > { %3678 = vst [vmem:[#allocation11_spill] sm:$0xff] %v2952_v44  ;;  %v713_v32 = vsub.s32 4294967266, %v2936_v34  ;;  %v1060_v29 = vand.u32 8388607, %v3659_v63  ;;  %v1065_v28 = vsel %vm1064_vm9, %v1063_v40, 0  ;;  %v3680_v3 = vshll.u32 %v2896_v2, 23 }
 0x142   : > { %v2965_v55 = vor.u32 %v2913_v20, %v3679_v52  ;;  %v1215_v41 = vadd.s32 1, %v2947_v60  ;;  %v1067_v14 = vand.u32 31, %v1065_v28  ;;  %v3681_v43 = vand.u32 2147483647, %v2571_v16 }
 0x143   : > { %v2972_v8 = vor.u32 4788187, %v3680_v3  ;;  %vm1977_vm10 = vcmp.lt.s32.totalorder %v1976_v57, 0  ;;  %v913_v50 = vclz %v1971_v35  ;;  %v1212_v45 = vmul.u32 %v1205_v4, %v1196_v21 }
 0x144   : > { %v2977_v5 = vand.u32 8388607, %v3681_v43  ;;  %vm1214_vm11 = vc.u32 %v2952_v44, %v2946_v1  ;;  %v1068_v27 = vsub.s32 32, %v1067_v14  ;;  %v2985_v25 = vadd.s32 127, %v713_v32 }
 0x145   : > { %v1216_v2 = vsel %vm1214_vm11, %v1215_v41, %v2947_v60  ;;  %v1061_v26 = vor.u32 8388608, %v1060_v29  ;;  %v2987_v38 = vsel %vm1977_vm10, 0, %v1976_v57  ;;  %v3682_v13 = vmov 2475754826  }
 0x146   : > { %v1217_v10 = vadd.s32 %v1216_v2, %v1212_v45  ;;  %v1071_v4 = vshrl.u32 %v3682_v13, %v1068_v27  ;;  %v3683_v56 = vmov 2131351028   ;;  %v446_v35 = vshll.u32 %v3676_v46, %v2793_v36 }
 0x147   : > { %v1074_v62 = vshrl.u32 %v3683_v56, %v1068_v27  ;;  %v1972_v51 = vadd.s32 4294967294, %v913_v50  ;;  %v1070_v60 = vshll.u32 %v3676_v46, %v1067_v14  ;;  %v447_v52 = vshrl.u32 %v3682_v13, %v2807_v7 }
 0x148   : > { %v1218_v21 = vadd.s32 536870912, %v1217_v10  ;;  %v1066_v32 = vshrl.u32 %v1065_v28, 5  ;;  %v1073_v3 = vshll.u32 %v3682_v13, %v1067_v14  ;;  %v1076_v57 = vshll.u32 %v3683_v56, %v1067_v14 }
 0x149   : > { %v1077_v29 = vshrl.u32 %v3673_v18, %v1068_v27  ;;  %v1072_v43 = vor.u32 %v1071_v4, %v1070_v60  ;;  %v1079_v45 = vshll.u32 %v3673_v18, %v1067_v14  ;;  %v3684_v2 = vmov 920167782  }
 0x14a   : > { %v2999_v41 = vshrl.u32 %v1218_v21, 30  ;;  %v1080_v50 = vshrl.u32 %v3684_v2, %v1068_v27  ;;  %v1075_v63 = vor.u32 %v1074_v62, %v1073_v3  ;;  %v1082_v40 = vshll.u32 %v3684_v2, %v1067_v14 }
 0x14b   : > { %v1078_v9 = vor.u32 %v1077_v29, %v1076_v57  ;;  %v1083_v20 = vshrl.u32 %v3675_v30, %v1068_v27  ;;  %v1101_v22 = vshll.u32 %v1061_v26, 8  ;;  %v449_v1 = vshll.u32 %v3682_v13, %v2793_v36 }
 0x14c   : > { %v1220_v28 = vshll.u32 %v2999_v41, 30  ;;  %v1081_v16 = vor.u32 %v1080_v50, %v1079_v45  ;;  %v448_v44 = vor.u32 %v447_v52, %v446_v35  ;;  %v450_v4 = vshrl.u32 %v3683_v56, %v2807_v7 }
 0x14d   : > { %v1084_v21 = vor.u32 %v1083_v20, %v1082_v40  ;;  %v452_v62 = vshll.u32 %v3683_v56, %v2793_v36  ;;  %vm1973_vm13 = vcmp.lt.s32.totalorder %v1972_v51, 0  ;;  %vm1085_vm14 = vcmp.lt.s32.totalorder %v1066_v32, 1 }
 0x14e   : > { %v3012_v60 = vsub.s32 %v1217_v10, %v1220_v28  ;;  %vm1088_vm15 = vcmp.lt.s32.totalorder %v1066_v32, 4  ;;  %vm1087_vm0 = vcmp.lt.s32.totalorder %v1066_v32, 3  ;;  %v1093_v14 = vsel %vm1085_vm14, %v1072_v43, %v1075_v63 }
 0x14f   : > { %v1090_v30 = vsel %vm1088_vm15, %v1078_v9, 2102212464  ;;  %v1094_v26 = vsel %vm1088_vm15, %v1081_v16, 920167782  ;;  %v1069_v3 = vshrl.u32 %v3676_v46, %v1068_v27  ;;  %vm1086_vm1 = vcmp.lt.s32.totalorder %v1066_v32, 2 }
 0x150   : > { %v1095_v20 = vsel %vm1087_vm0, %v1078_v9, %v1094_v26  ;;  %v1097_v40 = vsel %vm1085_vm14, %v1075_v63, %v1078_v9  ;;  %v1098_v35 = vsel %vm1088_vm15, %v1084_v21, 1326507024  ;;  %v451_v52 = vor.u32 %v450_v4, %v449_v1 }
 0x151   : > { %v1096_v13 = vsel %vm1086_vm1, %v1093_v14, %v1095_v20  ;;  %v453_v36 = vshrl.u32 %v3673_v18, %v2807_v7  ;;  %v1223_v10 = vsub.s32 0, %v3012_v60  ;;  %v1089_v56 = vsel %vm1085_vm14, %v1069_v3, %v1072_v43 }
 0x152   : > { %v1091_v57 = vsel %vm1087_vm0, %v1075_v63, %v1090_v30  ;;  %v1099_v29 = vsel %vm1087_vm0, %v1081_v16, %v1098_v35  ;;  %v3020_v2 = vmul.u32.u64.low %v1101_v22, %v1096_v13  ;;  %v3021_v50 = vmul.u32.u64.high %v1101_v22, %v1096_v13, %v3020_v2 }
 0x153   : > { %v1100_v45 = vsel %vm1086_vm1, %v1097_v40, %v1099_v29  ;;  %v454_v27 = vor.u32 %v453_v36, %v452_v62  ;;  %v437_v1 = vor.u32 8388608, %v2977_v5  ;;  %v445_v18 = vshrl.u32 %v3676_v46, %v2807_v7 }
 0x154   : > { %v3024_v9 = vmul.u32.u64.low %v1101_v22, %v1100_v45  ;;  %v3025_v28 = vmul.u32.u64.high %v1101_v22, %v1100_v45, %v3024_v9  ;;  %v1025_v21 = vsub.s32 4294967266, %v2987_v38  ;;  %v1092_v63 = vsel %vm1086_vm1, %v1089_v56, %v1091_v57 }
 0x155   : > { %vm461_vm2 = vcmp.lt.s32.totalorder %v2841_v59, 1  ;;  %vm463_vm3 = vcmp.lt.s32.totalorder %v2841_v59, 3  ;;  %v3035_v16 = vsel %vm1973_vm13, 0, %v1972_v51  ;;  %v1983_v43 = vmin.u32 %v1223_v10, %v3012_v60 }
 0x156   : > { %v469_v4 = vsel %vm461_vm2, %v448_v44, %v451_v52  ;;  %v471_v7 = vsel %vm463_vm3, %v454_v27, %v2892_v6  ;;  %v1111_v46 = vadd.s32 1, %v3021_v50  ;;  %vm462_vm4 = vcmp.lt.s32.totalorder %v2841_v59, 2 }
 0x157   : > { %v466_v5 = vsel %vm464_vm12, %v454_v27, 2102212464  ;;  %v473_v51 = vsel %vm461_vm2, %v451_v52, %v454_v27  ;;  %v1108_v32 = vmul.u32 %v1101_v22, %v1092_v63  ;;  %vm1110_vm5 = vc.u32 %v3025_v28, %v3020_v2 }
 0x158   : > { %v472_v62 = vsel %vm462_vm4, %v469_v4, %v471_v7  ;;  %v475_v6 = vsel %vm463_vm3, %v2847_v11, %v2910_v47  ;;  %v921_v30 = vsub.s32 4294967266, %v3035_v16  ;;  %v1112_v14 = vsel %vm1110_vm5, %v1111_v46, %v3021_v50 }
 0x159   : > { %v476_v26 = vsel %vm462_vm4, %v473_v51, %v475_v6  ;;  %v477_v3 = vshll.u32 %v437_v1, 8  ;;  %v1225_v22 = vclz %v1983_v43  ;;  %v1113_v20 = vadd.s32 %v1112_v14, %v1108_v32 }
 0x15a   : > { %v465_v40 = vsel %vm461_vm2, %v445_v18, %v448_v44  ;;  %v467_v13 = vsel %vm463_vm3, %v451_v52, %v466_v5  ;;  %v615_v10 = vcvt.s32.f32 %v2965_v55  ;;  %v693_v56 = vadd.s32 %v2747_v39, %v2745_v37 }
 0x15b   : > { %v3065_v35 = vmul.u32.u64.low %v477_v3, %v476_v26  ;;  %v3066_v36 = vmul.u32.u64.high %v477_v3, %v476_v26, %v3065_v35  ;;  %v3068_v11 = vmul.u32.u64.low %v477_v3, %v472_v62  ;;  %v3069_v47 = vmul.u32.u64.high %v477_v3, %v472_v62, %v3068_v11 }
 0x15c   : > { %v715_v57 = vshll.u32 %v2985_v25, 23  ;;  %v1114_v29 = vadd.s32 536870912, %v1113_v20  ;;  %v613_v44 = vand.u32 2147483647, %v2972_v8  ;;  %v814_v52 = vshll.u32 %v2800_v53, %v2916_v48 }
 0x15d   : > { %v3685_v45 = vsub.s32 32, %v2916_v48  ;;  %v468_v27 = vsel %vm462_vm4, %v465_v40, %v467_v13  ;;  %v3686_v55 = vshll.u32 %v2958_v54, 23  ;;  %v3687_v37 = vsub.s32 32, %v2936_v34 }
 0x15e   : > { %v1026_v25 = vadd.s32 127, %v1025_v21  ;;  %v3088_v1 = vshrl.u32 %v1114_v29, 30  ;;  %v922_v8 = vadd.s32 127, %v921_v30  ;;  %v1984_v18 = vadd.s32 4294967294, %v1225_v22 }
 0x15f   : > { %v815_v50 = vshrl.u32 %v2956_v31, %v3685_v45  ;;  %v820_v9 = vor.u32 4788187, %v3686_v55  ;;  %v711_v39 = vshrl.u32 %v693_v56, %v3687_v37  ;;  %vm486_vm12 = vc.u32 %v3066_v36, %v3068_v11 }
 0x160   : > { %v487_v53 = vadd.s32 1, %v3069_v47  ;;  %v710_v59 = vshll.u32 %v2817_v33, %v2936_v34  ;;  %v716_v48 = vor.u32 4788187, %v715_v57  ;;  %v1116_v31 = vshll.u32 %v3088_v1, 30 }
 0x161   : > { %v484_v54 = vmul.u32 %v477_v3, %v468_v27  ;;  %v816_v63 = vor.u32 %v815_v50, %v814_v52  ;;  %v1021_v43 = vsub.s32 32, %v2987_v38  ;;  %v917_v21 = vsub.s32 32, %v3035_v16 }
 0x162   : > { %v488_v4 = vsel %vm486_vm12, %v487_v53, %v3069_v47  ;;  %v712_v7 = vor.u32 %v711_v39, %v710_v59  ;;  %v1005_v46 = vadd.s32 %v2811_v15, %v2820_v42  ;;  %v3101_v5 = vsub.s32 %v1113_v20, %v1116_v31 }
 0x163   : > { %v489_v51 = vadd.s32 %v488_v4, %v484_v54  ;;  %v1027_v32 = vshll.u32 %v1026_v25, 23  ;;  %v901_v34 = vadd.s32 %v2875_v61, %v2885_v19  ;;  %v923_v33 = vshll.u32 %v922_v8, 23 }
 0x164   : > { %vm1985_vm6 = vcmp.lt.s32.totalorder %v1984_v18, 0  ;;  %v821_v62 = vand.u32 2147483647, %v820_v9  ;;  %v717_v6 = vand.u32 2147483647, %v716_v48  ;;  %v1119_v30 = vsub.s32 0, %v3101_v5 }
 0x165   : > { %v490_v14 = vadd.s32 536870912, %v489_v51  ;;  %v616_v26 = vmul.f32 %v615_v10, %v613_v44  ;;  %v823_v3 = vcvt.s32.f32 %v816_v63  ;;  %v1023_v22 = vshrl.u32 %v1005_v46, %v1021_v43  ;;  %v3688_v46 = vld [vmem:[#allocation11_spill] sm:$0xff] }
 0x166   : > { %v919_v40 = vshrl.u32 %v901_v34, %v917_v21  ;;  %v719_v13 = vcvt.s32.f32 %v712_v7  ;;  %v3106_v15 = vsel %vm1985_vm6, 0, %v1984_v18  ;;  %v1979_v42 = vmin.u32 %v1119_v30, %v3101_v5 }
 0x167   : > { %v3109_v20 = vshrl.u32 %v490_v14, 30  ;;  %v1022_v61 = vshll.u32 %v2882_v58, %v2987_v38  ;;  %v1028_v19 = vor.u32 4788187, %v1027_v32  ;;  %v918_v35 = vshll.u32 %v2939_v49, %v3035_v16 }
 0x168   : > { %v924_v47 = vor.u32 4788187, %v923_v33  ;;  %v824_v56 = vmul.f32 %v823_v3, %v821_v62  ;;  %v720_v10 = vmul.f32 %v719_v13, %v717_v6  ;;  %v1121_v57 = vclz %v1979_v42 }
 0x169   : > { %v492_v29 = vshll.u32 %v3109_v20, 30  ;;  %v1024_v44 = vor.u32 %v1023_v22, %v1022_v61  ;;  %v920_v52 = vor.u32 %v919_v40, %v918_v35  ;;  %v1233_v45 = vsub.s32 4294967266, %v3106_v15 }
 0x16a   : > { %vm535_vm7 = vcmp.lt.s32.totalorder %v2502_v12, 0  ;;  %v1980_v50 = vadd.s32 4294967294, %v1121_v57  ;;  %v617_v58 = vxor.u32 2147483648, %v616_v26  ;;  %vm743_vm8 = vcmp.lt.s32.totalorder %v2508_v17, 0 }
 0x16b   : > { %v3118_v27 = vsub.s32 %v489_v51, %v492_v29  ;;  %v1029_v38 = vand.u32 2147483647, %v1028_v19  ;;  %v925_v49 = vand.u32 2147483647, %v924_v47  ;;  %v825_v16 = vxor.u32 2147483648, %v824_v56  ;;  %v3689_v51 = vld [vmem:[#allocation10_spill] sm:$0xff] }
 0x16c   : > { %v721_v55 = vxor.u32 2147483648, %v720_v10  ;;  %vm1981_vm9 = vcmp.lt.s32.totalorder %v1980_v50, 0  ;;  %v1031_v37 = vcvt.s32.f32 %v1024_v44  ;;  %v927_v39 = vcvt.s32.f32 %v920_v52  ;;  %v3693_v47 = vld [vmem:[#allocation3_spill] sm:$0xff] }
 0x16d   : > { %v495_v9 = vsub.s32 0, %v3118_v27  ;;  %v1234_v25 = vadd.s32 127, %v1233_v45  ;;  %v1124_v8 = vsel %vm1981_vm9, 0, %v1980_v50  ;;  %v1109_v18 = vadd.s32 %v3020_v2, %v3025_v28 }
 0x16e   : > { %v1125_v53 = vsub.s32 32, %v1124_v8  ;;  %v1129_v59 = vsub.s32 4294967266, %v1124_v8  ;;  %vm639_vm10 = vcmp.lt.s32.totalorder %v2515_v24, 0  ;;  %v1032_v31 = vmul.f32 %v1031_v37, %v1029_v38 }
 0x16f   : > { %v1955_v48 = vmin.u32 %v495_v9, %v3118_v27  ;;  %v928_v54 = vmul.f32 %v927_v39, %v925_v49  ;;  %v1229_v63 = vsub.s32 32, %v3106_v15  ;;  %vm951_vm11 = vcmp.lt.s32.totalorder %v2653_v23, 0 }
 0x170   : > { %v1126_v43 = vshll.u32 %v3101_v5, %v1124_v8  ;;  %v1127_v21 = vshrl.u32 %v1109_v18, %v1125_v53  ;;  %v1130_v4 = vadd.s32 127, %v1129_v59  ;;  %v618_v2 = vsel %vm535_vm7, %v617_v58, %v616_v26 }
 0x171   : > { %v497_v7 = vclz %v1955_v48  ;;  %v826_v28 = vsel %vm743_vm8, %v825_v16, %v824_v56  ;;  %vm847_vm13 = vcmp.lt.s32.totalorder %v2777_v0, 0  ;;  %v1213_v32 = vadd.s32 %v3689_v51, %v3688_v46 }
 0x172   : > { %v1235_v34 = vshll.u32 %v1234_v25, 23  ;;  %v722_v33 = vsel %vm639_vm10, %v721_v55, %v720_v10  ;;  %v1128_v62 = vor.u32 %v1127_v21, %v1126_v43  ;;  %v1131_v5 = vshll.u32 %v1130_v4, 23  ;;  %v3694_v10 = vld [vmem:[#allocation8_spill] sm:$0xff] }
 0x173   : > { %v1956_v6 = vadd.s32 4294967294, %v497_v7  ;;  %v1033_v30 = vxor.u32 2147483648, %v1032_v31  ;;  %v929_v14 = vxor.u32 2147483648, %v928_v54  ;;  %v1231_v3 = vshrl.u32 %v1213_v32, %v1229_v63 }
 0x174   : > { %v3690_v26 = vand.u32 2147483647, %v2502_v12  ;;  %v1230_v40 = vshll.u32 %v3012_v60, %v3106_v15  ;;  %v1132_v13 = vor.u32 4788187, %v1131_v5  ;;  %v1236_v61 = vor.u32 4788187, %v1235_v34 }
 0x175   : > { %vm1957_vm15 = vcmp.lt.s32.totalorder %v1956_v6, 0  ;;  %v485_v19 = vadd.s32 %v3068_v11, %v3066_v36  ;;  %v619_v56 = vsub.s32 4, %v3693_v47  ;;  %vm1055_vm0 = vcmp.lt.s32.totalorder %v3694_v10, 0  ;;  %v3695_v15 = vld [vmem:[#allocation2_spill] sm:$0xff]  ;;  %v3699_v36 = vld [vmem:[#allocation5_spill] sm:$0xff]  ;;  %v3709_v5 = vld [vmem:[#allocation4_spill] sm:$0xff] }
 0x176   : > { %vm3140_vm14 = vcmp.le.f32.partialorder %v3690_v26, 0.7853982  ;;  %v500_v35 = vsel %vm1957_vm15, 0, %v1956_v6  ;;  %v1133_v57 = vand.u32 2147483647, %v1132_v13  ;;  %v1135_v29 = vcvt.s32.f32 %v1128_v62 }
 0x177   : > { %v621_v42 = vsel %vm3140_vm14, %v2502_v12, %v618_v2  ;;  %v501_v44 = vsub.s32 32, %v500_v35  ;;  %v505_v52 = vsub.s32 4294967266, %v500_v35  ;;  %v1232_v60 = vor.u32 %v1231_v3, %v1230_v40 }
 0x178   : > { %vm431_vm1 = vcmp.lt.s32.totalorder %v3695_v15, 0  ;;  %2316 = vcosq.f32 %v621_v42  ;;  %v3696_v45 = vand.u32 2147483647, %v2515_v24  ;;  %v723_v11 = vsub.s32 4, %v3699_v36 }
 0x179   : > { %v1136_v58 = vmul.f32 %v1135_v29, %v1133_v57  ;;  %v502_v38 = vshll.u32 %v3118_v27, %v500_v35  ;;  %v503_v49 = vshrl.u32 %v485_v19, %v501_v44  ;;  %v506_v16 = vadd.s32 127, %v505_v52  ;;  %v3716_v57 = vld [vmem:[#allocation9_spill] sm:$0xff]  ;;  %v3717_v52 = vld [vmem:[#allocation6_spill] sm:$0xff] }
 0x17a   : > { %vm3156_vm2 = vcmp.le.f32.partialorder %v3696_v45, 0.7853982  ;;  %v1034_v55 = vsel %vm951_vm11, %v1033_v30, %v1032_v31  ;;  %v1237_v9 = vand.u32 2147483647, %v1236_v61  ;;  %2318 = vsinq.f32 %v621_v42 }
 0x17b   : > { %v725_v37 = vsel %vm3156_vm2, %v2515_v24, %v722_v33  ;;  %v930_v39 = vsel %vm847_vm13, %v929_v14, %v928_v54  ;;  %v3700_v25 = vand.u32 2147483647, %v3695_v15  ;;  %v504_v27 = vor.u32 %v503_v49, %v502_v38 }
 0x17c   : > { %v507_v18 = vshll.u32 %v506_v16, 23  ;;  %v620_v53 = vsel %vm535_vm7, %v619_v56, %v3693_v47  ;;  %v1239_v59 = vcvt.s32.f32 %v1232_v60  ;;  %v1137_v48 = vxor.u32 2147483648, %v1136_v58 }
 0x17d   : > { %vm3171_vm3 = vcmp.le.f32.partialorder %v3700_v25, 0.7853982  ;;  %v724_v31 = vsel %vm639_vm10, %v723_v11, %v3699_v36  ;;  %v3703_v54 = vand.u32 2147483647, %v2508_v17  ;;  %v515_v21 = vsub.s32 4, %v3109_v20 }
 0x17e   : > { %v508_v43 = vor.u32 4788187, %v507_v18  ;;  %2320 = vcosq.f32 %v725_v37  ;;  %v1240_v7 = vmul.f32 %v1239_v59, %v1237_v9  ;;  %v622_v2 = vsel %vm3140_vm14, 0, %v620_v53 }
 0x17f   : > { %vm3183_vm4 = vcmp.le.f32.partialorder %v3703_v54, 0.7853982  ;;  %2322 = vsinq.f32 %v725_v37  ;;  %v3706_v46 = vand.u32 2147483647, %v2777_v0  ;;  %v511_v34 = vcvt.s32.f32 %v504_v27 }
 0x180   : > { %v829_v4 = vsel %vm3183_vm4, %v2508_v17, %v826_v28  ;;  %v509_v32 = vand.u32 2147483647, %v508_v43  ;;  %v726_v33 = vsel %vm3156_vm2, 0, %v724_v31  ;;  %v1138_v62 = vsel %vm1055_vm0, %v1137_v48, %v1136_v58 }
 0x181   : > { %vm3195_vm5 = vcmp.le.f32.partialorder %v3706_v46, 0.7853982  ;;  %v827_v6 = vsub.s32 4, %v3709_v5  ;;  %2324 = vcosq.f32 %v829_v4  ;;  %v3710_v30 = vand.u32 2147483647, %v2653_v23 }
 0x182   : > { %v933_v28 = vsel %vm3195_vm5, %v2777_v0, %v930_v39  ;;  %v512_v3 = vmul.f32 %v511_v34, %v509_v32  ;;  %v516_v26 = vsel %vm431_vm1, %v515_v21, %v3109_v20  ;;  %2326 = vsinq.f32 %v829_v4 }
 0x183   : > { %vm3209_vm12 = vcmp.le.f32.partialorder %v3710_v30, 0.7853982  ;;  %v1241_v40 = vxor.u32 2147483648, %v1240_v7  ;;  %v626_v13 = vadd.s32 3, %v622_v2  ;;  %2328 = vcosq.f32 %v933_v28 }
 0x184   : > { %v1037_v22 = vsel %vm3209_vm12, %v2653_v23, %v1034_v55  ;;  %v3713_v42 = vand.u32 2147483647, %v3694_v10  ;;  %v513_v19 = vxor.u32 2147483648, %v512_v3  ;;  %v730_v35 = vadd.s32 3, %v726_v33  ;;  %v3718_v55 = vld [vmem:[#allocation7_spill] sm:$0xff] }
 0x185   : > { %2330 = vsinq.f32 %v933_v28  ;;  %v518_v47 = vsel %vm3171_vm3, 0, %v516_v26  ;;  %v828_v56 = vsel %vm743_vm8, %v827_v6, %v3709_v5  ;;  %v931_v29 = vsub.s32 4, %v3716_v57  ;;  %v2317_v44 = vpop.eup %2316 }
 0x186   : > { %vm3221_vm6 = vcmp.le.f32.partialorder %v3713_v42, 0.7853982  ;;  %2332 = vcosq.f32 %v1037_v22  ;;  %vm1159_vm7 = vcmp.lt.s32.totalorder %v3717_v52, 0  ;;  %v514_v60 = vsel %vm431_vm1, %v513_v19, %v512_v3 }
 0x187   : > { %v1141_v20 = vsel %vm3221_vm6, %v3694_v10, %v1138_v62  ;;  %v1242_v45 = vsel %vm1159_vm7, %v1241_v40, %v1240_v7  ;;  %v517_v50 = vsel %vm3171_vm3, %v3695_v15, %v514_v60  ;;  %v627_v36 = vand.u32 3, %v626_v13  ;;  %v2319_v11 = vpop.eup %2318 }
 0x188   : > { %2334 = vcosq.f32 %v1141_v20  ;;  %v522_v58 = vadd.s32 3, %v518_v47  ;;  %v3242_v38 = vand.u32 3, %v730_v35  ;;  %v830_v49 = vsel %vm3183_vm4, 0, %v828_v56 }
 0x189   : > { %2336 = vsinq.f32 %v1141_v20  ;;  %v932_v16 = vsel %vm847_vm13, %v931_v29, %v3716_v57  ;;  %v1035_v9 = vsub.s32 4, %v3718_v55  ;;  %v3719_v37 = vand.u32 2147483647, %v3717_v52 }
 0x18a   : > { %2338 = vcosq.f32 %v517_v50  ;;  %v633_v25 = vxor.u32 2147483648, %v2317_v44  ;;  %v1139_v8 = vsub.s32 4, %v3088_v1  ;;  %vm628_vm9 = vcmp.lt.s32.totalorder %v627_v36, 2 }
 0x18b   : > { %2340 = vsinq.f32 %v517_v50  ;;  %vm3252_vm8 = vcmp.le.f32.partialorder %v3719_v37, 0.7853982  ;;  %v2321_v18 = vpop.eup %2320  ;;  %v630_v53 = vxor.u32 2147483648, %v2319_v11  ;;  %vm625_vm10 = vweird.f32 %v2502_v12 }
 0x18c   : > { %2342 = vsinq.f32 %v1037_v22  ;;  %v1245_v27 = vsel %vm3252_vm8, %v3717_v52, %v1242_v45  ;;  %v2323_v59 = vpop.eup %2322  ;;  %vm629_vm13 = vcmp.eq.s32.totalorder %v627_v36, 0  ;;  %vm632_vm14 = vcmp.eq.s32.totalorder %v627_v36, 2 }
 0x18d   : > { %v834_v48 = vadd.s32 3, %v830_v49  ;;  %v934_v31 = vsel %vm3195_vm5, 0, %v932_v16  ;;  %v3263_v54 = vand.u32 3, %v522_v58  ;;  %vm732_vm15 = vcmp.lt.s32.totalorder %v3242_v38, 2 }
 0x18e   : > { %v1036_v63 = vsel %vm951_vm11, %v1035_v9, %v3718_v55  ;;  %2344 = vcosq.f32 %v1245_v27  ;;  %v2325_v43 = vpop.eup %2324  ;;  %v634_v21 = vsel %vm632_vm14, %v633_v25, %v2319_v11  ;;  %v1140_v4 = vsel %vm1055_vm0, %v1139_v8, %v3088_v1 }
 0x18f   : > { %v1243_v7 = vsub.s32 4, %v2999_v41  ;;  %2346 = vsinq.f32 %v1245_v27  ;;  %v2327_v2 = vpop.eup %2326  ;;  %v631_v46 = vsel %vm629_vm13, %v2317_v44, %v630_v53  ;;  %v734_v51 = vxor.u32 2147483648, %v2323_v59 }
 0x190   : > { %v737_v32 = vxor.u32 2147483648, %v2321_v18  ;;  %v938_v34 = vadd.s32 3, %v934_v31  ;;  %v2329_v33 = vpop.eup %2328  ;;  %vm733_vm1 = vcmp.eq.s32.totalorder %v3242_v38, 0  ;;  %vm736_vm11 = vcmp.eq.s32.totalorder %v3242_v38, 2 }
 0x191   : > { %v835_v28 = vand.u32 3, %v834_v48  ;;  %v1038_v62 = vsel %vm3209_vm12, 0, %v1036_v63  ;;  %vm524_vm0 = vcmp.lt.s32.totalorder %v3263_v54, 2  ;;  %vm525_vm2 = vcmp.eq.s32.totalorder %v3263_v54, 0 }
 0x192   : > { %v2331_v5 = vpop.eup %2330  ;;  %vm528_vm3 = vcmp.eq.s32.totalorder %v3263_v54, 2  ;;  %v1142_v1 = vsel %vm3221_vm6, 0, %v1140_v4  ;;  %vm521_vm4 = vweird.f32 %v3695_v15  ;;  %v635_v30 = vsel %vm628_vm9, %v631_v46, %v634_v21 }
 0x193   : > { %v3282_v6 = vpop.eup %2332  ;;  %vm729_vm5 = vweird.f32 %v2515_v24  ;;  %v838_v14 = vxor.u32 2147483648, %v2327_v2  ;;  %v841_v3 = vxor.u32 2147483648, %v2325_v43  ;;  %v1244_v26 = vsel %vm1159_vm7, %v1243_v7, %v2999_v41 }
 0x194   : > { %v735_v40 = vsel %vm733_vm1, %v2321_v18, %v734_v51  ;;  %v738_v13 = vsel %vm736_vm11, %v737_v32, %v2323_v59  ;;  %v939_v42 = vand.u32 3, %v938_v34  ;;  %v1042_v61 = vadd.s32 3, %v1038_v62 }
 0x195   : > { %v2335_v22 = vpop.eup %2334  ;;  %vm836_vm12 = vcmp.lt.s32.totalorder %v835_v28, 2  ;;  %vm837_vm6 = vcmp.eq.s32.totalorder %v835_v28, 0  ;;  %v945_v35 = vxor.u32 2147483648, %v2329_v33  ;;  %v1146_v20 = vadd.s32 3, %v1142_v1  ;;  %v1998_v1 = vld [vmem:[%s3624_s3 + $0xd8] sm:$0xff] }
 0x196   : > { %v2337_v19 = vpop.eup %2336  ;;  %v636_v56 = vsel %vm625_vm10, nan, %v635_v30  ;;  %vm840_vm9 = vcmp.eq.s32.totalorder %v835_v28, 2  ;;  %v942_v41 = vxor.u32 2147483648, %v2331_v5  ;;  %v1246_v57 = vsel %vm3252_vm8, 0, %v1244_v26  ;;  %v1996_v30 = vld [vmem:[%s3624_s3 + $0xc8] sm:$0xff]  ;;  %v1993_v26 = vld [vmem:[%s3624_s3 + $0xb0] sm:$0xff] }
 0x197   : > { %v2339_v47 = vpop.eup %2338  ;;  %v739_v60 = vsel %vm732_vm15, %v735_v40, %v738_v13  ;;  %v839_v45 = vsel %vm837_vm6, %v2325_v43, %v838_v14  ;;  %v842_v50 = vsel %vm840_vm9, %v841_v3, %v2327_v2  ;;  %vm941_vm7 = vcmp.eq.s32.totalorder %v939_v42, 0  ;;  %v1995_v14 = vld [vmem:[%s3624_s3 + $0xc0] sm:$0xff]  ;;  %v1994_v3 = vld [vmem:[%s3624_s3 + $0xb8] sm:$0xff] }
 0x198   : > { %v2341_v29 = vpop.eup %2340  ;;  %v529_v44 = vxor.u32 2147483648, %v2339_v47  ;;  %vm944_vm13 = vcmp.eq.s32.totalorder %v939_v42, 2  ;;  %v1043_v58 = vand.u32 3, %v1042_v61  ;;  %v1147_v16 = vand.u32 3, %v1146_v20  ;;  %v1991_v40 = vld [vmem:[%s3624_s3 + $0xa0] sm:$0xff]  ;;  %v1990_v13 = vld [vmem:[%s3624_s3 + $0x98] sm:$0xff] }
 0x199   : > { %v2343_v36 = vpop.eup %2342  ;;  %v526_v11 = vxor.u32 2147483648, %v2341_v29  ;;  %v946_v49 = vsel %vm944_vm13, %v945_v35, %v2331_v5  ;;  %v1250_v55 = vadd.s32 3, %v1246_v57  ;;  %v943_v37 = vsel %vm941_vm7, %v2329_v33, %v942_v41  ;;  %v2002_v5 = vld [vmem:[%s3624_s3 + $0xf8] sm:$0xff]  ;;  %v1988_v61 = vld [vmem:[%s3624_s3 + $0x88] sm:$0xff]  ;;  %v1986_v35 = vld [vmem:[%s3625_s4] ss:$0 sm:$0xff] }
 0x19a   : > { %v530_v12 = vsel %vm528_vm3, %v529_v44, %v2341_v29  ;;  %v1150_v39 = vxor.u32 2147483648, %v2337_v19  ;;  %v1153_v38 = vxor.u32 2147483648, %v2335_v22  ;;  %vm937_vm8 = vweird.f32 %v2777_v0  ;;  %2150 = vmatprep.subr.mxu0 %v2002_v5 }
 0x19b   : > { %v527_v9 = vsel %vm525_vm2, %v2339_v47, %v526_v11  ;;  %v2345_v25 = vpop.eup %2344  ;;  %v1046_v27 = vxor.u32 2147483648, %v2343_v36  ;;  %v1049_v18 = vxor.u32 2147483648, %v3282_v6  ;;  %v740_v48 = vsel %vm729_vm5, nan, %v739_v60  ;;  %2151 = vmatpush3.msra.mxu0 %v2002_v5 }
 0x19c   : > { %v531_v8 = vsel %vm524_vm0, %v527_v9, %v530_v12  ;;  %v2347_v53 = vpop.eup %2346  ;;  %v843_v31 = vsel %vm836_vm12, %v839_v45, %v842_v50  ;;  %vm940_vm10 = vcmp.lt.s32.totalorder %v939_v42, 2  ;;  %vm1045_vm14 = vcmp.eq.s32.totalorder %v1043_v58, 0  ;;  %v1989_v42 = vld [vmem:[%s3624_s3 + $0x90] sm:$0xff] }
 0x19d   : > { %v532_v59 = vsel %vm521_vm4, nan, %v531_v8  ;;  %v947_v63 = vsel %vm940_vm10, %v943_v37, %v946_v49  ;;  %vm1149_vm15 = vcmp.eq.s32.totalorder %v1147_v16, 0  ;;  %vm1152_vm1 = vcmp.eq.s32.totalorder %v1147_v16, 2 }
 0x19e   : > { %2138 = vmatprep.mubr.f32.mxu1 %v532_v59  ;;  %vm1048_vm11 = vcmp.eq.s32.totalorder %v1043_v58, 2  ;;  %v1151_v54 = vsel %vm1149_vm15, %v2335_v22, %v1150_v39  ;;  %v1154_v43 = vsel %vm1152_vm1, %v1153_v38, %v2337_v19  ;;  %v1251_v21 = vand.u32 3, %v1250_v55  ;;  %v1992_v22 = vld [vmem:[%s3624_s3 + $0xa8] sm:$0xff]  ;;  %v1987_v19 = vld [vmem:[%s3624_s3 + $0x80] sm:$0xff] }
 0x19f   : > { %2139 = vmatmul.mubr.f32.vlgmr.msra.gmra.mxu1 %v636_v56  ;;  %v1047_v15 = vsel %vm1045_vm14, %v3282_v6, %v1046_v27  ;;  %v1050_v4 = vsel %vm1048_vm11, %v1049_v18, %v2343_v36  ;;  %v1254_v7 = vxor.u32 2147483648, %v2347_v53  ;;  %v1257_v24 = vxor.u32 2147483648, %v2345_v25  ;;  %v1997_v6 = vld [vmem:[%s3624_s3 + $0xd0] sm:$0xff] }
 0x1a0   : > { %2141 = vmatprep.mubr.f32.mxu1 %v740_v48  ;;  %vm833_vm0 = vweird.f32 %v2508_v17  ;;  %v948_v2 = vsel %vm937_vm8, nan, %v947_v63  ;;  %vm1148_vm2 = vcmp.lt.s32.totalorder %v1147_v16, 2  ;;  %vm1044_vm3 = vcmp.lt.s32.totalorder %v1043_v58, 2 }
 0x1a1   : > { %v844_v46 = vsel %vm833_vm0, nan, %v843_v31  ;;  %v1155_v51 = vsel %vm1148_vm2, %v1151_v54, %v1154_v43  ;;  %v1051_v32 = vsel %vm1044_vm3, %v1047_v15, %v1050_v4  ;;  %vm1253_vm4 = vcmp.eq.s32.totalorder %v1251_v21, 0 }
 0x1a2   : > { %vm1256_vm5 = vcmp.eq.s32.totalorder %v1251_v21, 2  ;;  %vm1145_vm12 = vweird.f32 %v3694_v10  ;;  %v1255_v34 = vsel %vm1253_vm4, %v2345_v25, %v1254_v7  ;;  %vm1041_vm6 = vweird.f32 %v2653_v23  ;;  %v2001_v10 = vld [vmem:[%s3624_s3 + $0xf0] sm:$0xff]  ;;  %v2000_v23 = vld [vmem:[%s3624_s3 + $0xe8] sm:$0xff] }
 0x1a3   : > { %2142 = vmatmul.mubr.f32.gmra.mxu1 %v844_v46  ;;  %v1258_v33 = vsel %vm1256_vm5, %v1257_v24, %v2347_v53  ;;  %v1156_v28 = vsel %vm1145_vm12, nan, %v1155_v51  ;;  %v1052_v17 = vsel %vm1041_vm6, nan, %v1051_v32  ;;  %vm1252_vm9 = vcmp.lt.s32.totalorder %v1251_v21, 2  ;;  %2152 = vmatprep.subr.mxu0 %v2001_v10 }
 0x1a4   : > { %2144 = vmatprep.mubr.f32.mxu1 %v948_v2  ;;  %v1259_v0 = vsel %vm1252_vm9, %v1255_v34, %v1258_v33  ;;  %vm1249_vm7 = vweird.f32 %v3717_v52  ;;  %2153 = vmatpush3.msra.mxu0 %v2001_v10  ;;  %v1999_v52 = vld [vmem:[%s3624_s3 + $0xe0] sm:$0xff] }
 0x1a5   : > { %v1260_v62 = vsel %vm1249_vm7, nan, %v1259_v0  ;;  %2154 = vmatprep.subr.mxu0 %v2000_v23 }
 0x1a6   : > { %2155 = vmatpush3.msra.mxu0 %v2000_v23 }
 0x1a7   : > { %2145 = vmatmul.mubr.f32.gmra.mxu1 %v1052_v17  ;;  %2156 = vmatprep.subr.mxu0 %v1999_v52 }
 0x1a8   : > { %2147 = vmatprep.mubr.f32.mxu1 %v1156_v28  ;;  %2157 = vmatpush3.msra.mxu0 %v1999_v52 }
 0x1a9   : > { %2158 = vmatprep.subr.mxu0 %v1998_v1 }
 0x1aa   : > { %2159 = vmatpush3.msra.mxu0 %v1998_v1 }
 0x1ab   : > { %2148 = vmatmul.mubr.f32.gmra.mxu1 %v1260_v62  ;;  %2160 = vmatprep.subr.mxu0 %v1997_v6 }
 0x1ac   : > { %2161 = vmatpush3.msra.mxu0 %v1997_v6 }
 0x1ad   : > { %2162 = vmatprep.subr.mxu0 %v1996_v30 }
 0x1ae   : > { %2163 = vmatpush3.msra.mxu0 %v1996_v30 }
 0x1af   : > { %2164 = vmatprep.subr.mxu0 %v1995_v14 }
 0x1b0   : > { %2165 = vmatpush3.msra.mxu0 %v1995_v14 }
 0x1b1   : > { %2166 = vmatprep.subr.mxu0 %v1994_v3 }
 0x1b2   : > { %2167 = vmatpush3.msra.mxu0 %v1994_v3 }
 0x1b3   : > { %2168 = vmatprep.subr.mxu0 %v1993_v26 }
 0x1b4   : > { %2169 = vmatpush3.msra.mxu0 %v1993_v26 }
 0x1b5   : > { %2170 = vmatprep.subr.mxu0 %v1992_v22 }
 0x1b6   : > { %2171 = vmatpush3.msra.mxu0 %v1992_v22 }
 0x1b7   : > { %2172 = vmatprep.subr.mxu0 %v1991_v40 }
 0x1b8   : > { %2173 = vmatpush3.msra.mxu0 %v1991_v40 }
 0x1b9   : > { %2174 = vmatprep.subr.mxu0 %v1990_v13 }
 0x1ba   : > { %2175 = vmatpush3.msra.mxu0 %v1990_v13 }
 0x1bb   : > { %2176 = vmatprep.subr.mxu0 %v1989_v42 }
 0x1bc   : > { %2177 = vmatpush3.msra.mxu0 %v1989_v42 }
 0x1bd   : > { %2178 = vmatprep.subr.mxu0 %v1988_v61 }
 0x1be   : > { %2179 = vmatpush3.msra.mxu0 %v1988_v61 }
 0x1bf   : > { %2180 = vmatprep.subr.mxu0 %v1987_v19 }
 0x1c0   : > { %2181 = vmatpush3.msra.mxu0 %v1987_v19 }
 0x25f   : > { %v2140_v20 = vpop.f32.mrf.mxu1 }
 0x260   : > { %v3371_v47 = vadd.f32 %v2140_v20, %v1986_v35  ;;  %v1745_v20 = vld [vmem:[%s3626_s5 + $0x10] sm:$0xff] }
 0x261   : > { %v1350_v56 = vpop.f32.mrf.mxu1 }
 0x262   : > { %v1398_v41 = vmin.f32 %v3371_v47, 20.0  ;;  %v3374_v57 = vadd.f32 %v1986_v35, %v1350_v56  ;;  %vm1390_vm13 = vcmp.gt.f32.partialorder %v3371_v47, 20.0 }
 0x263   : > { %v2143_v29 = vpop.f32.mrf.mxu1 }
 0x264   : > { %v1407_v44 = vmul.f32 1.442695, %v1398_v41  ;;  %v1397_v60 = vmin.f32 %v3374_v57, 20.0  ;;  %v3377_v45 = vadd.f32 %v2143_v29, %v1986_v35  ;;  %vm1389_vm8 = vcmp.gt.f32.partialorder %v3374_v57, 20.0 }
 0x265   : > { %v1360_v50 = vpop.f32.mrf.mxu1 }
 0x266   : > { %2348 = vpow2.f32 %v1407_v44  ;;  %v1405_v36 = vmul.f32 1.442695, %v1397_v60  ;;  %v1400_v11 = vmin.f32 %v3377_v45, 20.0  ;;  %v3380_v58 = vadd.f32 %v1986_v35, %v1360_v50 }
 0x267   : > { %v2146_v12 = vpop.f32.mrf.mxu1  ;;  %vm1392_vm11 = vcmp.gt.f32.partialorder %v3377_v45, 20.0 }
 0x268   : > { %2350 = vpow2.f32 %v1405_v36  ;;  %v1411_v49 = vmul.f32 1.442695, %v1400_v11  ;;  %v1399_v16 = vmin.f32 %v3380_v58, 20.0  ;;  %v3383_v55 = vadd.f32 %v2146_v12, %v1986_v35 }
 0x269   : > { %v1370_v9 = vpop.f32.mrf.mxu1  ;;  %vm1391_vm0 = vcmp.gt.f32.partialorder %v3380_v58, 20.0 }
 0x26a   : > { %2352 = vpow2.f32 %v1411_v49  ;;  %v1409_v37 = vmul.f32 1.442695, %v1399_v16  ;;  %v1402_v39 = vmin.f32 %v3383_v55, 20.0  ;;  %v3386_v38 = vadd.f32 %v1986_v35, %v1370_v9 }
 0x26b   : > { %v2149_v25 = vpop.f32.mrf.mxu1  ;;  %vm1394_vm5 = vcmp.gt.f32.partialorder %v3383_v55, 20.0 }
 0x26c   : > { %2354 = vpow2.f32 %v1409_v37  ;;  %v1415_v8 = vmul.f32 1.442695, %v1402_v39  ;;  %v1401_v27 = vmin.f32 %v3386_v38, 20.0  ;;  %v3389_v18 = vadd.f32 %v2149_v25, %v1986_v35 }
 0x26d   : > { %v1380_v53 = vpop.f32.mrf.mxu1  ;;  %vm1393_vm4 = vcmp.gt.f32.partialorder %v3386_v38, 20.0 }
 0x26e   : > { %2356 = vpow2.f32 %v1415_v8  ;;  %v1413_v59 = vmul.f32 1.442695, %v1401_v27  ;;  %v1404_v48 = vmin.f32 %v3389_v18, 20.0  ;;  %v3392_v31 = vadd.f32 %v1986_v35, %v1380_v53 }
 0x26f   : > { %vm1396_vm7 = vcmp.gt.f32.partialorder %v3389_v18, 20.0 }
 0x270   : > { %2358 = vpow2.f32 %v1413_v59  ;;  %v1419_v63 = vmul.f32 1.442695, %v1404_v48  ;;  %v1403_v54 = vmin.f32 %v3392_v31, 20.0  ;;  %vm1395_vm9 = vcmp.gt.f32.partialorder %v3392_v31, 20.0 }
 0x272   : > { %2360 = vpow2.f32 %v1419_v63  ;;  %v1417_v43 = vmul.f32 1.442695, %v1403_v54 }
 0x273   : > { %v2349_v21 = vpop.eup %2348 }
 0x274   : > { %v1430_v15 = vadd.f32 1.0, %v2349_v21  ;;  %2362 = vpow2.f32 %v1417_v43  ;;  %v1433_v28 = vmul.f32 -0.5, %v2349_v21  ;;  %v1436_v6 = vand.u32 2147483647, %v2349_v21 }
 0x275   : > { %v2351_v4 = vpop.eup %2350 }
 0x276   : > { %2364 = vlog2.f32 %v1430_v15  ;;  %v1421_v7 = vadd.f32 1.0, %v2351_v4  ;;  %v1424_v17 = vmul.f32 -0.5, %v2351_v4  ;;  %v1434_v23 = vadd.f32 1.0, %v1433_v28 }
 0x277   : > { %v2353_v24 = vpop.eup %2352  ;;  %v1427_v26 = vand.u32 2147483647, %v2351_v4  ;;  %vm3410_vm10 = vcmp.lt.f32.partialorder %v1436_v6, 0.0004427343 }
 0x278   : > { %2366 = vlog2.f32 %v1421_v7  ;;  %v1448_v2 = vadd.f32 1.0, %v2353_v24  ;;  %v1451_v1 = vmul.f32 -0.5, %v2353_v24  ;;  %v1425_v30 = vadd.f32 1.0, %v1424_v17 }
 0x279   : > { %v2355_v46 = vpop.eup %2354  ;;  %v1454_v22 = vand.u32 2147483647, %v2353_v24  ;;  %v1435_v61 = vmul.f32 %v2349_v21, %v1434_v23  ;;  %vm1428_vm14 = vcmp.lt.f32.partialorder %v1427_v26, 0.0004427343  ;;  %v1753_v26 = vld [vmem:[%s3626_s5 + $0x50] sm:$0xff] }
 0x27a   : > { %v1439_v51 = vadd.f32 1.0, %v2355_v46  ;;  %2368 = vlog2.f32 %v1448_v2  ;;  %v1442_v52 = vmul.f32 -0.5, %v2355_v46  ;;  %v1452_v35 = vadd.f32 1.0, %v1451_v1 }
 0x27b   : > { %v3395_v32 = vpop.eup %2356  ;;  %v1426_v41 = vmul.f32 %v2351_v4, %v1425_v30  ;;  %v1445_v50 = vand.u32 2147483647, %v2355_v46  ;;  %vm3417_vm15 = vcmp.lt.f32.partialorder %v1454_v22, 0.0004427343  ;;  %v1752_v22 = vld [vmem:[%s3626_s5 + $0x48] sm:$0xff] }
 0x27c   : > { %2370 = vlog2.f32 %v1439_v51  ;;  %v1466_v34 = vadd.f32 1.0, %v3395_v32  ;;  %v1469_v13 = vmul.f32 -0.5, %v3395_v32  ;;  %v1443_v19 = vadd.f32 1.0, %v1442_v52 }
 0x27d   : > { %v3398_v33 = vpop.eup %2358  ;;  %v1472_v16 = vand.u32 2147483647, %v3395_v32  ;;  %v1453_v25 = vmul.f32 %v2353_v24, %v1452_v35  ;;  %vm1446_vm1 = vcmp.lt.f32.partialorder %v1445_v50, 0.0004427343  ;;  %v1746_v35 = vld [vmem:[%s3626_s5 + $0x18] sm:$0xff] }
 0x27e   : > { %v1457_v0 = vadd.f32 1.0, %v3398_v33  ;;  %2372 = vlog2.f32 %v1466_v34  ;;  %v1460_v29 = vmul.f32 -0.5, %v3398_v33  ;;  %v1470_v49 = vadd.f32 1.0, %v1469_v13  ;;  %v1750_v13 = vld [vmem:[%s3626_s5 + $0x38] sm:$0xff] }
 0x27f   : > { %v3401_v62 = vpop.eup %2360  ;;  %v1444_v39 = vmul.f32 %v2355_v46, %v1443_v19  ;;  %v1463_v63 = vand.u32 2147483647, %v3398_v33  ;;  %vm3436_vm2 = vcmp.lt.f32.partialorder %v1472_v16, 0.0004427343  ;;  %v1747_v19 = vld [vmem:[%s3626_s5 + $0x20] sm:$0xff] }
 0x280   : > { %2374 = vlog2.f32 %v1457_v0  ;;  %v1484_v5 = vadd.f32 1.0, %v3401_v62  ;;  %v1487_v8 = vmul.f32 -0.5, %v3401_v62  ;;  %v1461_v59 = vadd.f32 1.0, %v1460_v29  ;;  %v2004_v29 = vld [vmem:[%s3625_s4 + $0x1] ss:$0 sm:$0xff] }
 0x281   : > { %v3404_v10 = vpop.eup %2362  ;;  %v1490_v2 = vand.u32 2147483647, %v3401_v62  ;;  %vm1464_vm3 = vcmp.lt.f32.partialorder %v1463_v63, 0.0004427343 }
 0x282   : > { %v1475_v14 = vadd.f32 1.0, %v3404_v10  ;;  %2376 = vlog2.f32 %v1484_v5  ;;  %v1478_v48 = vmul.f32 -0.5, %v3404_v10  ;;  %v1488_v24 = vadd.f32 1.0, %v1487_v8 }
 0x283   : > { %v2365_v3 = vpop.eup %2364  ;;  %v1462_v34 = vmul.f32 %v3398_v33, %v1461_v59  ;;  %v1481_v17 = vand.u32 2147483647, %v3404_v10  ;;  %vm1491_vm12 = vcmp.lt.f32.partialorder %v1490_v2, 0.0004427343 }
 0x284   : > { %v1432_v40 = vmul.f32 0.6931472, %v2365_v3  ;;  %2378 = vlog2.f32 %v1475_v14  ;;  %v1479_v28 = vadd.f32 1.0, %v1478_v48  ;;  %v1489_v33 = vmul.f32 %v3401_v62, %v1488_v24  ;;  %v1754_v3 = vld [vmem:[%s3626_s5 + $0x58] sm:$0xff] }
 0x285   : > { %v2367_v42 = vpop.eup %2366  ;;  %vm1482_vm6 = vcmp.lt.f32.partialorder %v1481_v17, 0.0004427343 }
 0x286   : > { %v1423_v56 = vmul.f32 0.6931472, %v2367_v42  ;;  %v1438_v60 = vsel %vm3410_vm10, %v1435_v61, %v1432_v40  ;;  %v1480_v6 = vmul.f32 %v3404_v10, %v1479_v28  ;;  %v1757_v10 = vld [vmem:[%s3626_s5 + $0x70] sm:$0xff]  ;;  %v1751_v40 = vld [vmem:[%s3626_s5 + $0x40] sm:$0xff]  ;;  %v1748_v61 = vld [vmem:[%s3626_s5 + $0x28] sm:$0xff] }
 0x287   : > { %v2369_v44 = vpop.eup %2368  ;;  %v1494_v27 = vsel %vm1390_vm13, %v3371_v47, %v1438_v60  ;;  %v1471_v47 = vmul.f32 %v3395_v32, %v1470_v49  ;;  %v1749_v42 = vld [vmem:[%s3626_s5 + $0x30] sm:$0xff] }
 0x288   : > { %v1429_v11 = vsel %vm1428_vm14, %v1426_v41, %v1423_v56  ;;  %v1450_v12 = vmul.f32 0.6931472, %v2369_v44  ;;  %v1744_v56 = vld [vmem:[%s3626_s5 + $0x8] sm:$0xff]  ;;  %v1743_v41 = vld [vmem:[%s3626_s5] sm:$0xff] }
 0x289   : > { %v2371_v9 = vpop.eup %2370  ;;  %v1493_v37 = vsel %vm1389_vm8, %v3374_v57, %v1429_v11 }
 0x28a   : > { %2182 = vmatprep.mubr.f32.mxu0 %v1493_v37  ;;  %v1441_v53 = vmul.f32 0.6931472, %v2371_v9  ;;  %v1456_v57 = vsel %vm3417_vm15, %v1453_v25, %v1450_v12 }
 0x28b   : > { %2183 = vmatmul.mubr.f32.vlgmr.msra.gmra.mxu0 %v1494_v27  ;;  %v2373_v54 = vpop.eup %2372  ;;  %v1496_v46 = vsel %vm1392_vm11, %v3377_v45, %v1456_v57 }
 0x28c   : > { %v1447_v43 = vsel %vm1446_vm1, %v1444_v39, %v1441_v53  ;;  %v1468_v7 = vmul.f32 0.6931472, %v2373_v54 }
 0x28d   : > { %v2375_v15 = vpop.eup %2374  ;;  %v1495_v4 = vsel %vm1391_vm0, %v3380_v58, %v1447_v43 }
 0x28e   : > { %2185 = vmatprep.mubr.f32.mxu0 %v1495_v4  ;;  %v1459_v51 = vmul.f32 0.6931472, %v2375_v15  ;;  %v1474_v32 = vsel %vm3436_vm2, %v1471_v47, %v1468_v7 }
 0x28f   : > { %2186 = vmatmul.mubr.f32.gmra.mxu0 %v1496_v46  ;;  %v2377_v0 = vpop.eup %2376  ;;  %v1498_v52 = vsel %vm1394_vm5, %v3383_v55, %v1474_v32  ;;  %v1758_v55 = vld [vmem:[%s3626_s5 + $0x78] sm:$0xff] }
 0x290   : > { %v1465_v58 = vsel %vm1464_vm3, %v1462_v34, %v1459_v51  ;;  %v1486_v45 = vmul.f32 0.6931472, %v2377_v0  ;;  %2194 = vmatprep.subr.mxu0 %v1758_v55  ;;  %2238 = vmatprep.subr.mxu1 %v1758_v55 }
 0x291   : > { %v2379_v5 = vpop.eup %2378  ;;  %v1497_v23 = vsel %vm1393_vm4, %v3386_v38, %v1465_v58  ;;  %2195 = vmatpush3.msra.mxu0 %v1758_v55  ;;  %2254 = vmatpush3.msra.mxu1 %v1758_v55 }
 0x292   : > { %2188 = vmatprep.mubr.f32.mxu0 %v1497_v23  ;;  %v1477_v1 = vmul.f32 0.6931472, %v2379_v5  ;;  %v1492_v30 = vsel %vm1491_vm12, %v1489_v33, %v1486_v45  ;;  %2196 = vmatprep.subr.mxu0 %v1757_v10 }
 0x293   : > { %2189 = vmatmul.mubr.f32.gmra.mxu0 %v1498_v52  ;;  %v1500_v62 = vsel %vm1396_vm7, %v3389_v18, %v1492_v30  ;;  %2239 = vmatprep.subr.mxu1 %v1757_v10  ;;  %v1755_v18 = vld [vmem:[%s3626_s5 + $0x60] sm:$0xff] }
 0x294   : > { %v1483_v14 = vsel %vm1482_vm6, %v1480_v6, %v1477_v1  ;;  %2197 = vmatpush3.msra.mxu0 %v1757_v10  ;;  %2255 = vmatpush3.msra.mxu1 %v1757_v10 }
 0x295   : > { %v1499_v38 = vsel %vm1395_vm9, %v3392_v31, %v1483_v14  ;;  %v1756_v31 = vld [vmem:[%s3626_s5 + $0x68] sm:$0xff] }
 0x296   : > { %2191 = vmatprep.mubr.f32.mxu0 %v1499_v38  ;;  %2198 = vmatprep.subr.mxu0 %v1756_v31 }
 0x297   : > { %2192 = vmatmul.mubr.f32.gmra.mxu0 %v1500_v62  ;;  %2240 = vmatprep.subr.mxu1 %v1756_v31 }
 0x298   : > { %2199 = vmatpush3.msra.mxu0 %v1756_v31  ;;  %2256 = vmatpush3.msra.mxu1 %v1756_v31 }
 0x299   : > { %2200 = vmatprep.subr.mxu0 %v1755_v18  ;;  %2241 = vmatprep.subr.mxu1 %v1755_v18 }
 0x29a   : > { %2201 = vmatpush3.msra.mxu0 %v1755_v18  ;;  %2257 = vmatpush3.msra.mxu1 %v1755_v18 }
 0x29b   : > { %2202 = vmatprep.subr.mxu0 %v1754_v3  ;;  %2242 = vmatprep.subr.mxu1 %v1754_v3 }
 0x29c   : > { %2203 = vmatpush3.msra.mxu0 %v1754_v3  ;;  %2258 = vmatpush3.msra.mxu1 %v1754_v3 }
 0x29d   : > { %2204 = vmatprep.subr.mxu0 %v1753_v26  ;;  %2243 = vmatprep.subr.mxu1 %v1753_v26 }
 0x29e   : > { %2205 = vmatpush3.msra.mxu0 %v1753_v26  ;;  %2259 = vmatpush3.msra.mxu1 %v1753_v26 }
 0x29f   : > { %2206 = vmatprep.subr.mxu0 %v1752_v22  ;;  %2244 = vmatprep.subr.mxu1 %v1752_v22 }
 0x2a0   : > { %2207 = vmatpush3.msra.mxu0 %v1752_v22  ;;  %2260 = vmatpush3.msra.mxu1 %v1752_v22 }
 0x2a1   : > { %2208 = vmatprep.subr.mxu0 %v1751_v40  ;;  %2245 = vmatprep.subr.mxu1 %v1751_v40 }
 0x2a2   : > { %2209 = vmatpush3.msra.mxu0 %v1751_v40  ;;  %2261 = vmatpush3.msra.mxu1 %v1751_v40 }
 0x2a3   : > { %2210 = vmatprep.subr.mxu0 %v1750_v13  ;;  %2246 = vmatprep.subr.mxu1 %v1750_v13 }
 0x2a4   : > { %2211 = vmatpush3.msra.mxu0 %v1750_v13  ;;  %2262 = vmatpush3.msra.mxu1 %v1750_v13 }
 0x2a5   : > { %2212 = vmatprep.subr.mxu0 %v1749_v42  ;;  %2247 = vmatprep.subr.mxu1 %v1749_v42 }
 0x2a6   : > { %2213 = vmatpush3.msra.mxu0 %v1749_v42  ;;  %2263 = vmatpush3.msra.mxu1 %v1749_v42 }
 0x2a7   : > { %2214 = vmatprep.subr.mxu0 %v1748_v61  ;;  %2248 = vmatprep.subr.mxu1 %v1748_v61 }
 0x2a8   : > { %2215 = vmatpush3.msra.mxu0 %v1748_v61  ;;  %2264 = vmatpush3.msra.mxu1 %v1748_v61 }
 0x2a9   : > { %2216 = vmatprep.subr.mxu0 %v1747_v19  ;;  %2249 = vmatprep.subr.mxu1 %v1747_v19 }
 0x2aa   : > { %2217 = vmatpush3.msra.mxu0 %v1747_v19  ;;  %2265 = vmatpush3.msra.mxu1 %v1747_v19 }
 0x2ab   : > { %2218 = vmatprep.subr.mxu0 %v1746_v35  ;;  %2250 = vmatprep.subr.mxu1 %v1746_v35 }
 0x2ac   : > { %2219 = vmatpush3.msra.mxu0 %v1746_v35  ;;  %2266 = vmatpush3.msra.mxu1 %v1746_v35 }
 0x2ad   : > { %2220 = vmatprep.subr.mxu0 %v1745_v20  ;;  %2251 = vmatprep.subr.mxu1 %v1745_v20 }
 0x2ae   : > { %2221 = vmatpush3.msra.mxu0 %v1745_v20  ;;  %2267 = vmatpush3.msra.mxu1 %v1745_v20 }
 0x2af   : > { %2222 = vmatprep.subr.mxu0 %v1744_v56  ;;  %2252 = vmatprep.subr.mxu1 %v1744_v56 }
 0x2b0   : > { %2223 = vmatpush3.msra.mxu0 %v1744_v56  ;;  %2268 = vmatpush3.msra.mxu1 %v1744_v56 }
 0x2b1   : > { %2224 = vmatprep.subr.mxu0 %v1743_v41  ;;  %2253 = vmatprep.subr.mxu1 %v1743_v41 }
 0x2b2   : > { %2225 = vmatpush3.msra.mxu0 %v1743_v41  ;;  %2269 = vmatpush3.msra.mxu1 %v1743_v41 }
 0x34b   : > { %v2184_v44 = vpop.f32.mrf.mxu0 }
 0x34c   : > { %v3508_v60 = vadd.f32 %v2184_v44, %v2004_v29 }
 0x34d   : > { %v1592_v50 = vpop.f32.mrf.mxu0 }
 0x34e   : > { %v1640_v36 = vmin.f32 %v3508_v60, 20.0  ;;  %v3511_v11 = vadd.f32 %v2004_v29, %v1592_v50  ;;  %vm1632_vm13 = vcmp.gt.f32.partialorder %v3508_v60, 20.0 }
 0x34f   : > { %v2187_v12 = vpop.f32.mrf.mxu0 }
 0x350   : > { %v1649_v49 = vmul.f32 1.442695, %v1640_v36  ;;  %v1639_v16 = vmin.f32 %v3511_v11, 20.0  ;;  %v3514_v9 = vadd.f32 %v2187_v12, %v2004_v29  ;;  %vm1631_vm8 = vcmp.gt.f32.partialorder %v3511_v11, 20.0 }
 0x351   : > { %v1602_v37 = vpop.f32.mrf.mxu0 }
 0x352   : > { %2380 = vpow2.f32 %v1649_v49  ;;  %v1647_v39 = vmul.f32 1.442695, %v1639_v16  ;;  %v1642_v25 = vmin.f32 %v3514_v9, 20.0  ;;  %v3517_v8 = vadd.f32 %v2004_v29, %v1602_v37 }
 0x353   : > { %v2190_v27 = vpop.f32.mrf.mxu0  ;;  %vm1634_vm14 = vcmp.gt.f32.partialorder %v3514_v9, 20.0 }
 0x354   : > { %2382 = vpow2.f32 %v1647_v39  ;;  %v1653_v53 = vmul.f32 1.442695, %v1642_v25  ;;  %v3519_v59 = vadd.f32 %v2190_v27, %v2004_v29  ;;  %v1641_v48 = vmin.f32 %v3517_v8, 20.0 }
 0x355   : > { %v1612_v57 = vpop.f32.mrf.mxu0  ;;  %vm1633_vm11 = vcmp.gt.f32.partialorder %v3517_v8, 20.0 }
 0x356   : > { %2384 = vpow2.f32 %v1653_v53  ;;  %v1644_v63 = vmin.f32 %v3519_v59, 20.0  ;;  %v3523_v54 = vadd.f32 %v2004_v29, %v1612_v57  ;;  %v1651_v43 = vmul.f32 1.442695, %v1641_v48 }
 0x357   : > { %v2193_v47 = vpop.f32.mrf.mxu0  ;;  %vm1636_vm5 = vcmp.gt.f32.partialorder %v3519_v59, 20.0 }
 0x358   : > { %v1657_v21 = vmul.f32 1.442695, %v1644_v63  ;;  %v1643_v15 = vmin.f32 %v3523_v54, 20.0  ;;  %v3526_v4 = vadd.f32 %v2193_v47, %v2004_v29  ;;  %2386 = vpow2.f32 %v1651_v43 }
 0x359   : > { %v1622_v7 = vpop.f32.mrf.mxu0  ;;  %vm1635_vm4 = vcmp.gt.f32.partialorder %v3523_v54, 20.0 }
 0x35a   : > { %2388 = vpow2.f32 %v1657_v21  ;;  %v1655_v24 = vmul.f32 1.442695, %v1643_v15  ;;  %v1646_v2 = vmin.f32 %v3526_v4, 20.0  ;;  %v3529_v46 = vadd.f32 %v2004_v29, %v1622_v7 }
 0x35b   : > { %vm1638_vm7 = vcmp.gt.f32.partialorder %v3526_v4, 20.0 }
 0x35c   : > { %2390 = vpow2.f32 %v1655_v24  ;;  %v1661_v51 = vmul.f32 1.442695, %v1646_v2  ;;  %v1645_v34 = vmin.f32 %v3529_v46, 20.0  ;;  %vm1637_vm9 = vcmp.gt.f32.partialorder %v3529_v46, 20.0 }
 0x35e   : > { %2392 = vpow2.f32 %v1661_v51  ;;  %v1659_v28 = vmul.f32 1.442695, %v1645_v34 }
 0x35f   : > { %v2381_v32 = vpop.eup %2380 }
 0x360   : > { %v1672_v17 = vadd.f32 1.0, %v2381_v32  ;;  %2394 = vpow2.f32 %v1659_v28  ;;  %v1675_v30 = vmul.f32 -0.5, %v2381_v32  ;;  %v1678_v18 = vand.u32 2147483647, %v2381_v32 }
 0x361   : > { %v2383_v0 = vpop.eup %2382 }
 0x362   : > { %2396 = vlog2.f32 %v1672_v17  ;;  %v1663_v58 = vadd.f32 1.0, %v2383_v0  ;;  %v1666_v62 = vmul.f32 -0.5, %v2383_v0  ;;  %v1676_v31 = vadd.f32 1.0, %v1675_v30 }
 0x363   : > { %v2385_v5 = vpop.eup %2384  ;;  %v1669_v13 = vand.u32 2147483647, %v2383_v0  ;;  %vm3552_vm10 = vcmp.lt.f32.partialorder %v1678_v18, 0.0004427343 }
 0x364   : > { %v1690_v23 = vadd.f32 1.0, %v2385_v5  ;;  %2398 = vlog2.f32 %v1663_v58  ;;  %v1693_v3 = vmul.f32 -0.5, %v2385_v5  ;;  %v1667_v40 = vadd.f32 1.0, %v1666_v62 }
 0x365   : > { %v3532_v45 = vpop.eup %2386  ;;  %v1696_v19 = vand.u32 2147483647, %v2385_v5  ;;  %v1677_v41 = vmul.f32 %v2381_v32, %v1676_v31  ;;  %vm1670_vm15 = vcmp.lt.f32.partialorder %v1669_v13, 0.0004427343 }
 0x366   : > { %2400 = vlog2.f32 %v1690_v23  ;;  %v1681_v52 = vadd.f32 1.0, %v3532_v45  ;;  %v1684_v42 = vmul.f32 -0.5, %v3532_v45  ;;  %v1694_v44 = vadd.f32 1.0, %v1693_v3 }
 0x367   : > { %v3534_v33 = vpop.eup %2388  ;;  %v1668_v12 = vmul.f32 %v2383_v0, %v1667_v40  ;;  %vm3559_vm1 = vcmp.lt.f32.partialorder %v1696_v19, 0.0004427343  ;;  %v1687_v25 = vand.u32 2147483647, %v3532_v45 }
 0x368   : > { %v1708_v1 = vadd.f32 1.0, %v3534_v33  ;;  %2402 = vlog2.f32 %v1681_v52  ;;  %v1711_v20 = vmul.f32 -0.5, %v3534_v33  ;;  %v1685_v49 = vadd.f32 1.0, %v1684_v42 }
 0x369   : > { %v3538_v6 = vpop.eup %2390  ;;  %v1714_v57 = vand.u32 2147483647, %v3534_v33  ;;  %v1695_v43 = vmul.f32 %v2385_v5, %v1694_v44  ;;  %vm1688_vm0 = vcmp.lt.f32.partialorder %v1687_v25, 0.0004427343 }
 0x36a   : > { %v1699_v14 = vadd.f32 1.0, %v3538_v6  ;;  %2404 = vlog2.f32 %v1708_v1  ;;  %v1702_v35 = vmul.f32 -0.5, %v3538_v6  ;;  %v1712_v48 = vadd.f32 1.0, %v1711_v20 }
 0x36b   : > { %v3541_v38 = vpop.eup %2392  ;;  %v1686_v51 = vmul.f32 %v3532_v45, %v1685_v49  ;;  %v1705_v34 = vand.u32 2147483647, %v3538_v6  ;;  %vm3580_vm2 = vcmp.lt.f32.partialorder %v1714_v57, 0.0004427343 }
 0x36c   : > { %2406 = vlog2.f32 %v1699_v14  ;;  %v1726_v55 = vadd.f32 1.0, %v3541_v38  ;;  %v1703_v53 = vadd.f32 1.0, %v1702_v35  ;;  %v1729_v15 = vmul.f32 -0.5, %v3541_v38 }
 0x36d   : > { %v3544_v10 = vpop.eup %2394  ;;  %vm1706_vm3 = vcmp.lt.f32.partialorder %v1705_v34, 0.0004427343 }
 0x36e   : > { %v1717_v26 = vadd.f32 1.0, %v3544_v10  ;;  %2408 = vlog2.f32 %v1726_v55  ;;  %v1720_v21 = vmul.f32 -0.5, %v3544_v10  ;;  %v1704_v0 = vmul.f32 %v3538_v6, %v1703_v53 }
 0x36f   : > { %v2397_v22 = vpop.eup %2396  ;;  %v1730_v52 = vadd.f32 1.0, %v1729_v15  ;;  %v1723_v30 = vand.u32 2147483647, %v3544_v10  ;;  %v1732_v6 = vand.u32 2147483647, %v3541_v38 }
 0x370   : > { %v1674_v61 = vmul.f32 0.6931472, %v2397_v22  ;;  %2410 = vlog2.f32 %v1717_v26  ;;  %v1721_v45 = vadd.f32 1.0, %v1720_v21 }
 0x371   : > { %v2399_v56 = vpop.eup %2398  ;;  %v1731_v3 = vmul.f32 %v3541_v38, %v1730_v52  ;;  %vm1724_vm12 = vcmp.lt.f32.partialorder %v1723_v30, 0.0004427343  ;;  %vm1733_vm6 = vcmp.lt.f32.partialorder %v1732_v6, 0.0004427343  ;;  %v2005_v38 = vld [vmem:[%s3627_s6] ss:$0 sm:$0xff] }
 0x372   : > { %v1665_v36 = vmul.f32 0.6931472, %v2399_v56  ;;  %v1680_v16 = vsel %vm3552_vm10, %v1677_v41, %v1674_v61  ;;  %v1722_v18 = vmul.f32 %v3544_v10, %v1721_v45 }
 0x373   : > { %v2401_v50 = vpop.eup %2400  ;;  %v1736_v24 = vsel %vm1632_vm13, %v3508_v60, %v1680_v16  ;;  %v1713_v60 = vmul.f32 %v3534_v33, %v1712_v48  ;;  %vm1871_vm13 = vcmask 64512  }
 0x374   : > { %v1692_v37 = vmul.f32 0.6931472, %v2401_v50  ;;  %v1671_v27 = vsel %vm1670_vm15, %v1668_v12, %v1665_v36 }
 0x375   : > { %v2403_v63 = vpop.eup %2402  ;;  %v1735_v47 = vsel %vm1631_vm8, %v3511_v11, %v1671_v27 }
 0x376   : > { %2226 = vmatprep.mubr.f32.mxu0 %v1735_v47  ;;  %v1683_v2 = vmul.f32 0.6931472, %v2403_v63  ;;  %v1698_v28 = vsel %vm3559_vm1, %v1695_v43, %v1692_v37 }
 0x377   : > { %v2405_v7 = vpop.eup %2404  ;;  %2227 = vmatmul.mubr.f32.vlgmr.msra.gmra.mxu0 %v1736_v24  ;;  %v1738_v1 = vsel %vm1634_vm14, %v3514_v9, %v1698_v28 }
 0x378   : > { %v1710_v11 = vmul.f32 0.6931472, %v2405_v7  ;;  %v1689_v17 = vsel %vm1688_vm0, %v1686_v51, %v1683_v2 }
 0x379   : > { %v2407_v32 = vpop.eup %2406  ;;  %v1737_v5 = vsel %vm1633_vm11, %v3517_v8, %v1689_v17 }
 0x37a   : > { %v1701_v23 = vmul.f32 0.6931472, %v2407_v32  ;;  %2229 = vmatprep.mubr.f32.mxu1 %v1737_v5  ;;  %v1716_v8 = vsel %vm3580_vm2, %v1713_v60, %v1710_v11 }
 0x37b   : > { %v2409_v33 = vpop.eup %2408  ;;  %2230 = vmatmul.mubr.f32.vlgmr.msra.gmra.mxu1 %v1738_v1  ;;  %v1740_v26 = vsel %vm1636_vm5, %v3519_v59, %v1716_v8 }
 0x37c   : > { %v1707_v14 = vsel %vm1706_vm3, %v1704_v0, %v1701_v23  ;;  %v1728_v31 = vmul.f32 0.6931472, %v2409_v33 }
 0x37d   : > { %v2411_v62 = vpop.eup %2410  ;;  %v1739_v55 = vsel %vm1635_vm4, %v3523_v54, %v1707_v14 }
 0x37e   : > { %2232 = vmatprep.mubr.f32.mxu1 %v1739_v55  ;;  %v1719_v9 = vmul.f32 0.6931472, %v2411_v62  ;;  %v1734_v40 = vsel %vm1733_vm6, %v1731_v3, %v1728_v31 }
 0x37f   : > { %2233 = vmatmul.mubr.f32.gmra.mxu1 %v1740_v26  ;;  %v1742_v13 = vsel %vm1638_vm7, %v3526_v4, %v1734_v40 }
 0x380   : > { %v1725_v22 = vsel %vm1724_vm12, %v1722_v18, %v1719_v9 }
 0x381   : > { %v1741_v54 = vsel %vm1637_vm9, %v3529_v46, %v1725_v22 }
 0x382   : > { %2235 = vmatprep.mubr.f32.mxu1 %v1741_v54 }
 0x383   : > { %2236 = vmatmul.mubr.f32.gmra.mxu1 %v1742_v13 }
 0x437   : > { %v2228_v59 = vpop.f32.mrf.mxu0 }
 0x438   : > { %v1838_v10 = vadd.f32 %v2228_v59, %v2005_v38 }
 0x439   : > { %v1832_v42 = vpop.f32.mrf.mxu0 }
 0x43a   : > { %1873 = vst.msk [vmem:[%s280_s18 + $0x8] sm:$0xff] %vm1871_vm13, %v1838_v10  ;;  %v1833_v46 = vadd.f32 %v2005_v38, %v1832_v42 }
 0x43b   : > { %v2231_v61 = vpop.f32.mrf.mxu1 }
 0x43c   : > { %1872 = vst.msk [vmem:[%s280_s18] sm:$0xff] %vm1871_vm13, %v1833_v46  ;;  %v1848_v4 = vadd.f32 %v2231_v61, %v2005_v38 }
 0x43d   : > { %v1842_v19 = vpop.f32.mrf.mxu1 }
 0x43e   : > { %1875 = vst.msk [vmem:[%s280_s18 + $0x18] sm:$0xff] %vm1871_vm13, %v1848_v4  ;;  %v1843_v35 = vadd.f32 %v2005_v38, %v1842_v19 }
 0x43f   : > { %v2234_v20 = vpop.f32.mrf.mxu1 }
 0x440   : > { %1874 = vst.msk [vmem:[%s280_s18 + $0x10] sm:$0xff] %vm1871_vm13, %v1843_v35  ;;  %v1858_v56 = vadd.f32 %v2234_v20, %v2005_v38 }
 0x441   : > { %v1852_v41 = vpop.f32.mrf.mxu1 }
 0x442   : > { %1877 = vst.msk [vmem:[%s280_s18 + $0x28] sm:$0xff] %vm1871_vm13, %v1858_v56  ;;  %v1853_v29 = vadd.f32 %v2005_v38, %v1852_v41 }
 0x443   : > { %v2237_v44 = vpop.f32.mrf.mxu1 }
 0x444   : > { %1876 = vst.msk [vmem:[%s280_s18 + $0x20] sm:$0xff] %vm1871_vm13, %v1853_v29  ;;  %v1868_v50 = vadd.f32 %v2237_v44, %v2005_v38 }
 0x445   : > { %v1862_v36 = vpop.f32.mrf.mxu1 }
 0x446   : > { %1879 = vst.msk [vmem:[%s280_s18 + $0x38] sm:$0xff] %vm1871_vm13, %v1868_v50  ;;  %v1863_v12 = vadd.f32 %v2005_v38, %v1862_v36 }
 0x448   : > { %1878 = vst.msk [vmem:[%s280_s18 + $0x30] sm:$0xff] %vm1871_vm13, %v1863_v12 }
 0x449 PF: > { %s17_s24 = sadd.s32 1, %s2418_s24  }
 0x44a   : > { %p14_p4 = scmp.ge.s32.totalorder %s17_s24, 6  }
 0x44c   :  { %16 = sbr.rel (!%p14_p4) target bundleno = 1 (0x1), region = 80 }

</bundles_post_ra>
